<compile_context>
chip_gen: v6e
topology: v6e:2x2x1
jax: 0.10.0
libtpu: 0.0.40
codegen_flags: <defaults>
</compile_context>

<pallas_src>
import math
import jax
import jax.numpy as jnp
from jax.experimental import pallas as pl
from jax.experimental.pallas import tpu as pltpu

# ----------------------------- model config (small) -------------------------
D_EMB = 32          # d_model   (768 in the reference module)
D_HID = 64          # dim_feedforward (3072 in the reference module)
NHEAD = 4           # nhead     (12 in the reference module)
NLAYERS = 2         # nlayers   (6 in the reference module)
NUM_CLASS = 15
NUM_CLASS_PAD = 128  # lane-dense padded classifier width
VOCAB = 100
MAX_LEN = 64
LN_EPS = 1e-5       # nn.LayerNorm default eps
SQRT2 = math.sqrt(2.0)


# ------------------------------- kernel helpers ------------------------------
def _layer_norm(x, gamma, beta):
    mu = jnp.mean(x, axis=-1, keepdims=True)
    var = jnp.mean((x - mu) ** 2, axis=-1, keepdims=True)
    return (x - mu) * jax.lax.rsqrt(var + LN_EPS) * gamma + beta


def _gelu_exact(x):
    # PyTorch F.gelu default (approximate='none'): 0.5 * x * (1 + erf(x / sqrt(2)))
    return 0.5 * x * (1.0 + jax.lax.erf(x / SQRT2))


# --------------------------------- kernel ------------------------------------
def fused_forward_kernel(x_ref,
                         wqkv_ref, bqkv_ref, wo_ref, bo_ref,
                         ln1_g_ref, ln1_b_ref,
                         w1_ref, b1_ref, w2_ref, b2_ref,
                         ln2_g_ref, ln2_b_ref,
                         wc_ref, bc_ref,
                         o_ref):
    """All encoder layers + pooling + classifier, whole batch, one grid step."""
    B, S, D = x_ref.shape
    H = NHEAD
    dh = D // H

    xf = x_ref[...].reshape(B * S, D)                  # (BS, D) flattened activations

    for l in range(NLAYERS):                           # static unroll over layers
        # --- multi-head self-attention (scale pre-folded into q weights) ----
        qkv = jnp.dot(xf, wqkv_ref[l],
                      preferred_element_type=jnp.float32) + bqkv_ref[l]   # (BS, 3D)
        q = qkv[:, 0 * D:1 * D].reshape(B, S, D)
        k = qkv[:, 1 * D:2 * D].reshape(B, S, D)
        v = qkv[:, 2 * D:3 * D].reshape(B, S, D)

        head_outs = []
        for h in range(H):                             # static loop over heads
            qh = q[:, :, h * dh:(h + 1) * dh]          # (B, S, dh)
            kh = k[:, :, h * dh:(h + 1) * dh]
            vh = v[:, :, h * dh:(h + 1) * dh]
            s = jnp.einsum('bqd,bkd->bqk', qh, kh,
                           preferred_element_type=jnp.float32)            # (B, S, S)
            m = jnp.max(s, axis=-1, keepdims=True)
            e = jnp.exp(s - m)
            p = e / jnp.sum(e, axis=-1, keepdims=True)
            head_outs.append(jnp.einsum('bqk,bkd->bqd', p, vh,
                                        preferred_element_type=jnp.float32))
        attn = jnp.concatenate(head_outs, axis=-1).reshape(B * S, D)       # (BS, D)
        attn = jnp.dot(attn, wo_ref[l],
                       preferred_element_type=jnp.float32) + bo_ref[l]

        # residual + LayerNorm 1 (attention dropout is identity in eval mode)
        x1 = _layer_norm(xf + attn, ln1_g_ref[l], ln1_b_ref[l])

        # --- feed forward: linear1 -> exact GELU -> linear2 -----------------
        h1 = jnp.dot(x1, w1_ref[l],
                     preferred_element_type=jnp.float32) + b1_ref[l]
        h1 = _gelu_exact(h1)
        h2 = jnp.dot(h1, w2_ref[l],
                     preferred_element_type=jnp.float32) + b2_ref[l]

        # residual + LayerNorm 2
        xf = _layer_norm(x1 + h2, ln2_g_ref[l], ln2_b_ref[l])

    # --- pooling (mean + max + L2-norm attention) + classifier --------------
    x = xf.reshape(B, S, D)
    mean_p = jnp.mean(x, axis=1)                                 # (B, D)
    max_p = jnp.max(x, axis=1)                                   # (B, D)

    scores = jnp.sqrt(jnp.sum(x * x, axis=-1, keepdims=True))    # (B, S, 1)  ||x||_2
    m = jnp.max(scores, axis=1, keepdims=True)                   # softmax over seq
    e = jnp.exp(scores - m)
    w = e / jnp.sum(e, axis=1, keepdims=True)
    att_p = jnp.sum(x * w, axis=1)                               # (B, D)

    combined = mean_p + max_p + att_p                            # (B, D)
    logits = jnp.dot(combined, wc_ref[...],
                     preferred_element_type=jnp.float32) + bc_ref[...]
    o_ref[...] = logits                                          # (B, 128) lane-dense


# ------------------------------- wrappers ------------------------------------
_NUM_KERNEL_INPUTS = 15


def forward(input_ids, params, pe):
    # glue: embedding lookup + positional encoding add (dropout = identity)
    x = jnp.take(params['embed'], input_ids, axis=0)             # (B, S, D)
    x = x + pe[None, :x.shape[1], :]
    B = x.shape[0]

    vmem_spec = pl.BlockSpec(memory_space=pltpu.MemorySpace.VMEM)
    logits_pad = pl.pallas_call(
        fused_forward_kernel,
        out_shape=jax.ShapeDtypeStruct((B, NUM_CLASS_PAD), jnp.float32),
        in_specs=[vmem_spec] * _NUM_KERNEL_INPUTS,
        out_specs=vmem_spec,
        # Single grid step: whole batch + all weights resident in VMEM (<1 MiB).
        # TODO(synk): at the real dims (D=768, D_HID=3072) the full-weight
        #             blocks exceed v7x's 64 MiB VMEM; tile over D_HID / heads
        #             with a grid + set vmem_limit_bytes, and use bf16 operands.
    )(x,
      params['wqkv'], params['bqkv'], params['wo'], params['bo'],
      params['ln1_g'], params['ln1_b'],
      params['w1'], params['b1'], params['w2'], params['b2'],
      params['ln2_g'], params['ln2_b'],
      params['wc'], params['bc'])
    return logits_pad[:, :NUM_CLASS]


def sinusoidal_pe(max_len, d_model):
    position = jnp.arange(max_len, dtype=jnp.float32)[:, None]
    div_term = jnp.exp(jnp.arange(0, d_model, 2, dtype=jnp.float32)
                       * (-math.log(10000.0) / d_model))
    pe = jnp.zeros((max_len, d_model), dtype=jnp.float32)
    pe = pe.at[:, 0::2].set(jnp.sin(position * div_term))
    pe = pe.at[:, 1::2].set(jnp.cos(position * div_term))
    return pe


def init_params(key):
    keys = jax.random.split(key, 2 + NLAYERS)
    embed = jax.random.normal(keys[0], (VOCAB, D_EMB), jnp.float32) * 0.02

    dh = D_EMB // NHEAD
    scale = 1.0 / math.sqrt(dh)

    wqkv, bqkv, wo, bo = [], [], [], []
    ln1_g, ln1_b, ln2_g, ln2_b = [], [], [], []
    w1, b1, w2, b2 = [], [], [], []
    for i in range(NLAYERS):
        lk = jax.random.split(keys[2 + i], 8)
        # PyTorch nn.Linear convention: weight is (out_features, in_features)
        wqkv_i = jax.random.normal(lk[0], (3 * D_EMB, D_EMB), jnp.float32) * 0.05
        bqkv_i = jax.random.normal(lk[1], (3 * D_EMB,), jnp.float32) * 0.01
        # fold the 1/sqrt(head_dim) attention scale into the q projection
        wqkv_i = wqkv_i.at[:D_EMB].multiply(scale)
        bqkv_i = bqkv_i.at[:D_EMB].multiply(scale)
        wqkv.append(wqkv_i.T)                                    # (in, out) for kernel
        bqkv.append(bqkv_i[None, :])                             # (1, 3D)
        wo.append((jax.random.normal(lk[2], (D_EMB, D_EMB), jnp.float32) * 0.05).T)
        bo.append(jax.random.normal(lk[3], (1, D_EMB), jnp.float32) * 0.01)
        ln1_g.append(jnp.ones((1, D_EMB), jnp.float32))
        ln1_b.append(jnp.zeros((1, D_EMB), jnp.float32))
        w1.append((jax.random.normal(lk[4], (D_HID, D_EMB), jnp.float32) * 0.05).T)
        b1.append(jax.random.normal(lk[5], (1, D_HID), jnp.float32) * 0.01)
        w2.append((jax.random.normal(lk[6], (D_EMB, D_HID), jnp.float32) * 0.05).T)
        b2.append(jax.random.normal(lk[7], (1, D_EMB), jnp.float32) * 0.01)
        ln2_g.append(jnp.ones((1, D_EMB), jnp.float32))
        ln2_b.append(jnp.zeros((1, D_EMB), jnp.float32))

    wck, bck = jax.random.split(keys[1])
    wc = jax.random.normal(wck, (NUM_CLASS, D_EMB), jnp.float32) * 0.05
    bc = jax.random.normal(bck, (NUM_CLASS,), jnp.float32) * 0.01
    # pre-transpose + zero-pad the classifier so the kernel output is lane-dense
    wc_pad = jnp.zeros((D_EMB, NUM_CLASS_PAD), jnp.float32).at[:, :NUM_CLASS].set(wc.T)
    bc_pad = jnp.zeros((1, NUM_CLASS_PAD), jnp.float32).at[:, :NUM_CLASS].set(bc[None, :])

    return dict(
        embed=embed,
        wqkv=jnp.stack(wqkv), bqkv=jnp.stack(bqkv),
        wo=jnp.stack(wo), bo=jnp.stack(bo),
        ln1_g=jnp.stack(ln1_g), ln1_b=jnp.stack(ln1_b),
        w1=jnp.stack(w1), b1=jnp.stack(b1),
        w2=jnp.stack(w2), b2=jnp.stack(b2),
        ln2_g=jnp.stack(ln2_g), ln2_b=jnp.stack(ln2_b),
        wc=wc_pad, bc=bc_pad,
    )


# --------------------------------- main --------------------------------------
if __name__ == "__main__":
    key = jax.random.PRNGKey(0)
    k_param, k_ids = jax.random.split(key)
    params = init_params(k_param)
    pe = sinusoidal_pe(MAX_LEN, D_EMB)

    B, S = 2, 8
    input_ids = jax.random.randint(k_ids, (B, S), 0, VOCAB)

    logits = forward(input_ids, params, pe)
    logits = jax.block_until_ready(logits)
    assert logits.shape == (B, NUM_CLASS)
    assert bool(jnp.all(jnp.isfinite(logits)))
    print("KERNEL_OK")
</pallas_src>

<mosaic_0001>
module attributes {stable_mosaic.version = 11 : i64} {
  func.func @fused_forward_kernel(%arg0: memref<2x8x32xf32, #tpu.memory_space<vmem>>, %arg1: memref<2x32x96xf32, #tpu.memory_space<vmem>>, %arg2: memref<2x1x96xf32, #tpu.memory_space<vmem>>, %arg3: memref<2x32x32xf32, #tpu.memory_space<vmem>>, %arg4: memref<2x1x32xf32, #tpu.memory_space<vmem>>, %arg5: memref<2x1x32xf32, #tpu.memory_space<vmem>>, %arg6: memref<2x1x32xf32, #tpu.memory_space<vmem>>, %arg7: memref<2x32x64xf32, #tpu.memory_space<vmem>>, %arg8: memref<2x1x64xf32, #tpu.memory_space<vmem>>, %arg9: memref<2x64x32xf32, #tpu.memory_space<vmem>>, %arg10: memref<2x1x32xf32, #tpu.memory_space<vmem>>, %arg11: memref<2x1x32xf32, #tpu.memory_space<vmem>>, %arg12: memref<2x1x32xf32, #tpu.memory_space<vmem>>, %arg13: memref<32x128xf32, #tpu.memory_space<vmem>>, %arg14: memref<1x128xf32, #tpu.memory_space<vmem>>, %arg15: memref<2x128xf32, #tpu.memory_space<vmem>>) attributes {dimension_semantics = [], scalar_prefetch = 0 : i64, scratch_operands = 0 : i64, tpu.core_type = #tpu.core_type<tc>} {
    %c0 = arith.constant 0 : index
    %c0_0 = arith.constant 0 : index
    %c0_1 = arith.constant 0 : index
    %0 = vector.load %arg0[%c0, %c0_0, %c0_1] : memref<2x8x32xf32, #tpu.memory_space<vmem>>, vector<2x8x32xf32>
    %1 = vector.shape_cast %0 : vector<2x8x32xf32> to vector<16x32xf32>
    %c0_2 = arith.constant 0 : index
    %c0_3 = arith.constant 0 : index
    %c0_4 = arith.constant 0 : index
    %2 = vector.load %arg1[%c0_2, %c0_3, %c0_4] : memref<2x32x96xf32, #tpu.memory_space<vmem>>, vector<1x32x96xf32>
    %3 = vector.shape_cast %2 : vector<1x32x96xf32> to vector<32x96xf32>
    %cst = arith.constant dense<0.000000e+00> : vector<16x96xf32>
    %4 = tpu.matmul %1, %3, %cst {dimension_numbers = #tpu.dot_dimension_numbers<[1], [0], [0], [1], [0, 0, 1, 1], [], []>} : vector<16x32xf32>, vector<32x96xf32>, vector<16x96xf32> -> vector<16x96xf32>
    %c0_5 = arith.constant 0 : index
    %c0_6 = arith.constant 0 : index
    %c0_7 = arith.constant 0 : index
    %5 = vector.load %arg2[%c0_5, %c0_6, %c0_7] : memref<2x1x96xf32, #tpu.memory_space<vmem>>, vector<1x1x96xf32>
    %6 = vector.shape_cast %5 : vector<1x1x96xf32> to vector<1x96xf32>
    %7 = vector.broadcast %6 : vector<1x96xf32> to vector<16x96xf32>
    %8 = arith.addf %4, %7 : vector<16x96xf32>
    %9 = vector.extract_strided_slice %8 {offsets = [0, 0], sizes = [16, 32], strides = [1, 1]} : vector<16x96xf32> to vector<16x32xf32>
    %10 = vector.shape_cast %9 : vector<16x32xf32> to vector<2x8x32xf32>
    %11 = vector.extract_strided_slice %8 {offsets = [0, 32], sizes = [16, 32], strides = [1, 1]} : vector<16x96xf32> to vector<16x32xf32>
    %12 = vector.shape_cast %11 : vector<16x32xf32> to vector<2x8x32xf32>
    %13 = vector.extract_strided_slice %8 {offsets = [0, 64], sizes = [16, 32], strides = [1, 1]} : vector<16x96xf32> to vector<16x32xf32>
    %14 = vector.shape_cast %13 : vector<16x32xf32> to vector<2x8x32xf32>
    %15 = vector.extract_strided_slice %10 {offsets = [0, 0, 0], sizes = [2, 8, 8], strides = [1, 1, 1]} : vector<2x8x32xf32> to vector<2x8x8xf32>
    %16 = vector.extract_strided_slice %12 {offsets = [0, 0, 0], sizes = [2, 8, 8], strides = [1, 1, 1]} : vector<2x8x32xf32> to vector<2x8x8xf32>
    %17 = vector.extract_strided_slice %14 {offsets = [0, 0, 0], sizes = [2, 8, 8], strides = [1, 1, 1]} : vector<2x8x32xf32> to vector<2x8x8xf32>
    "tpu.trace_start"() <{level = 10 : i32, message = "bqd,bkd->bqk"}> : () -> ()
    %cst_8 = arith.constant dense<0.000000e+00> : vector<2x8x8xf32>
    %18 = tpu.matmul %15, %16, %cst_8 {dimension_numbers = #tpu.dot_dimension_numbers<[2], [2], [1], [1], [0, 0, 0, 1, 1, 1], [0], [0]>} : vector<2x8x8xf32>, vector<2x8x8xf32>, vector<2x8x8xf32> -> vector<2x8x8xf32>
    "tpu.trace_stop"() : () -> ()
    %cst_9 = arith.constant dense<0xFF800000> : vector<2x8xf32>
    %19 = vector.multi_reduction <maximumf>, %18, %cst_9 [2] : vector<2x8x8xf32> to vector<2x8xf32>
    %20 = vector.shape_cast %19 : vector<2x8xf32> to vector<2x8x1xf32>
    %21 = vector.broadcast %20 : vector<2x8x1xf32> to vector<2x8x8xf32>
    %22 = arith.subf %18, %21 : vector<2x8x8xf32>
    %23 = math.exp %22 : vector<2x8x8xf32>
    %cst_10 = arith.constant dense<0.000000e+00> : vector<2x8xf32>
    %24 = vector.multi_reduction <add>, %23, %cst_10 [2] : vector<2x8x8xf32> to vector<2x8xf32>
    %25 = vector.shape_cast %24 : vector<2x8xf32> to vector<2x8x1xf32>
    %26 = vector.broadcast %25 : vector<2x8x1xf32> to vector<2x8x8xf32>
    %27 = arith.divf %23, %26 : vector<2x8x8xf32>
    "tpu.trace_start"() <{level = 10 : i32, message = "bqk,bkd->bqd"}> : () -> ()
    %cst_11 = arith.constant dense<0.000000e+00> : vector<2x8x8xf32>
    %28 = tpu.matmul %27, %17, %cst_11 {dimension_numbers = #tpu.dot_dimension_numbers<[2], [1], [1], [2], [0, 0, 0, 1, 1, 2], [0], [0]>} : vector<2x8x8xf32>, vector<2x8x8xf32>, vector<2x8x8xf32> -> vector<2x8x8xf32>
    "tpu.trace_stop"() : () -> ()
    %29 = vector.extract_strided_slice %10 {offsets = [0, 0, 8], sizes = [2, 8, 8], strides = [1, 1, 1]} : vector<2x8x32xf32> to vector<2x8x8xf32>
    %30 = vector.extract_strided_slice %12 {offsets = [0, 0, 8], sizes = [2, 8, 8], strides = [1, 1, 1]} : vector<2x8x32xf32> to vector<2x8x8xf32>
    %31 = vector.extract_strided_slice %14 {offsets = [0, 0, 8], sizes = [2, 8, 8], strides = [1, 1, 1]} : vector<2x8x32xf32> to vector<2x8x8xf32>
    "tpu.trace_start"() <{level = 10 : i32, message = "bqd,bkd->bqk"}> : () -> ()
    %cst_12 = arith.constant dense<0.000000e+00> : vector<2x8x8xf32>
    %32 = tpu.matmul %29, %30, %cst_12 {dimension_numbers = #tpu.dot_dimension_numbers<[2], [2], [1], [1], [0, 0, 0, 1, 1, 1], [0], [0]>} : vector<2x8x8xf32>, vector<2x8x8xf32>, vector<2x8x8xf32> -> vector<2x8x8xf32>
    "tpu.trace_stop"() : () -> ()
    %cst_13 = arith.constant dense<0xFF800000> : vector<2x8xf32>
    %33 = vector.multi_reduction <maximumf>, %32, %cst_13 [2] : vector<2x8x8xf32> to vector<2x8xf32>
    %34 = vector.shape_cast %33 : vector<2x8xf32> to vector<2x8x1xf32>
    %35 = vector.broadcast %34 : vector<2x8x1xf32> to vector<2x8x8xf32>
    %36 = arith.subf %32, %35 : vector<2x8x8xf32>
    %37 = math.exp %36 : vector<2x8x8xf32>
    %cst_14 = arith.constant dense<0.000000e+00> : vector<2x8xf32>
    %38 = vector.multi_reduction <add>, %37, %cst_14 [2] : vector<2x8x8xf32> to vector<2x8xf32>
    %39 = vector.shape_cast %38 : vector<2x8xf32> to vector<2x8x1xf32>
    %40 = vector.broadcast %39 : vector<2x8x1xf32> to vector<2x8x8xf32>
    %41 = arith.divf %37, %40 : vector<2x8x8xf32>
    "tpu.trace_start"() <{level = 10 : i32, message = "bqk,bkd->bqd"}> : () -> ()
    %cst_15 = arith.constant dense<0.000000e+00> : vector<2x8x8xf32>
    %42 = tpu.matmul %41, %31, %cst_15 {dimension_numbers = #tpu.dot_dimension_numbers<[2], [1], [1], [2], [0, 0, 0, 1, 1, 2], [0], [0]>} : vector<2x8x8xf32>, vector<2x8x8xf32>, vector<2x8x8xf32> -> vector<2x8x8xf32>
    "tpu.trace_stop"() : () -> ()
    %43 = vector.extract_strided_slice %10 {offsets = [0, 0, 16], sizes = [2, 8, 8], strides = [1, 1, 1]} : vector<2x8x32xf32> to vector<2x8x8xf32>
    %44 = vector.extract_strided_slice %12 {offsets = [0, 0, 16], sizes = [2, 8, 8], strides = [1, 1, 1]} : vector<2x8x32xf32> to vector<2x8x8xf32>
    %45 = vector.extract_strided_slice %14 {offsets = [0, 0, 16], sizes = [2, 8, 8], strides = [1, 1, 1]} : vector<2x8x32xf32> to vector<2x8x8xf32>
    "tpu.trace_start"() <{level = 10 : i32, message = "bqd,bkd->bqk"}> : () -> ()
    %cst_16 = arith.constant dense<0.000000e+00> : vector<2x8x8xf32>
    %46 = tpu.matmul %43, %44, %cst_16 {dimension_numbers = #tpu.dot_dimension_numbers<[2], [2], [1], [1], [0, 0, 0, 1, 1, 1], [0], [0]>} : vector<2x8x8xf32>, vector<2x8x8xf32>, vector<2x8x8xf32> -> vector<2x8x8xf32>
    "tpu.trace_stop"() : () -> ()
    %cst_17 = arith.constant dense<0xFF800000> : vector<2x8xf32>
    %47 = vector.multi_reduction <maximumf>, %46, %cst_17 [2] : vector<2x8x8xf32> to vector<2x8xf32>
    %48 = vector.shape_cast %47 : vector<2x8xf32> to vector<2x8x1xf32>
    %49 = vector.broadcast %48 : vector<2x8x1xf32> to vector<2x8x8xf32>
    %50 = arith.subf %46, %49 : vector<2x8x8xf32>
    %51 = math.exp %50 : vector<2x8x8xf32>
    %cst_18 = arith.constant dense<0.000000e+00> : vector<2x8xf32>
    %52 = vector.multi_reduction <add>, %51, %cst_18 [2] : vector<2x8x8xf32> to vector<2x8xf32>
    %53 = vector.shape_cast %52 : vector<2x8xf32> to vector<2x8x1xf32>
    %54 = vector.broadcast %53 : vector<2x8x1xf32> to vector<2x8x8xf32>
    %55 = arith.divf %51, %54 : vector<2x8x8xf32>
    "tpu.trace_start"() <{level = 10 : i32, message = "bqk,bkd->bqd"}> : () -> ()
    %cst_19 = arith.constant dense<0.000000e+00> : vector<2x8x8xf32>
    %56 = tpu.matmul %55, %45, %cst_19 {dimension_numbers = #tpu.dot_dimension_numbers<[2], [1], [1], [2], [0, 0, 0, 1, 1, 2], [0], [0]>} : vector<2x8x8xf32>, vector<2x8x8xf32>, vector<2x8x8xf32> -> vector<2x8x8xf32>
    "tpu.trace_stop"() : () -> ()
    %57 = vector.extract_strided_slice %10 {offsets = [0, 0, 24], sizes = [2, 8, 8], strides = [1, 1, 1]} : vector<2x8x32xf32> to vector<2x8x8xf32>
    %58 = vector.extract_strided_slice %12 {offsets = [0, 0, 24], sizes = [2, 8, 8], strides = [1, 1, 1]} : vector<2x8x32xf32> to vector<2x8x8xf32>
    %59 = vector.extract_strided_slice %14 {offsets = [0, 0, 24], sizes = [2, 8, 8], strides = [1, 1, 1]} : vector<2x8x32xf32> to vector<2x8x8xf32>
    "tpu.trace_start"() <{level = 10 : i32, message = "bqd,bkd->bqk"}> : () -> ()
    %cst_20 = arith.constant dense<0.000000e+00> : vector<2x8x8xf32>
    %60 = tpu.matmul %57, %58, %cst_20 {dimension_numbers = #tpu.dot_dimension_numbers<[2], [2], [1], [1], [0, 0, 0, 1, 1, 1], [0], [0]>} : vector<2x8x8xf32>, vector<2x8x8xf32>, vector<2x8x8xf32> -> vector<2x8x8xf32>
    "tpu.trace_stop"() : () -> ()
    %cst_21 = arith.constant dense<0xFF800000> : vector<2x8xf32>
    %61 = vector.multi_reduction <maximumf>, %60, %cst_21 [2] : vector<2x8x8xf32> to vector<2x8xf32>
    %62 = vector.shape_cast %61 : vector<2x8xf32> to vector<2x8x1xf32>
    %63 = vector.broadcast %62 : vector<2x8x1xf32> to vector<2x8x8xf32>
    %64 = arith.subf %60, %63 : vector<2x8x8xf32>
    %65 = math.exp %64 : vector<2x8x8xf32>
    %cst_22 = arith.constant dense<0.000000e+00> : vector<2x8xf32>
    %66 = vector.multi_reduction <add>, %65, %cst_22 [2] : vector<2x8x8xf32> to vector<2x8xf32>
    %67 = vector.shape_cast %66 : vector<2x8xf32> to vector<2x8x1xf32>
    %68 = vector.broadcast %67 : vector<2x8x1xf32> to vector<2x8x8xf32>
    %69 = arith.divf %65, %68 : vector<2x8x8xf32>
    "tpu.trace_start"() <{level = 10 : i32, message = "bqk,bkd->bqd"}> : () -> ()
    %cst_23 = arith.constant dense<0.000000e+00> : vector<2x8x8xf32>
    %70 = tpu.matmul %69, %59, %cst_23 {dimension_numbers = #tpu.dot_dimension_numbers<[2], [1], [1], [2], [0, 0, 0, 1, 1, 2], [0], [0]>} : vector<2x8x8xf32>, vector<2x8x8xf32>, vector<2x8x8xf32> -> vector<2x8x8xf32>
    "tpu.trace_stop"() : () -> ()
    %71 = tpu.concatenate %28, %42, %56, %70 in 2 : vector<2x8x8xf32>, vector<2x8x8xf32>, vector<2x8x8xf32>, vector<2x8x8xf32> -> vector<2x8x32xf32>
    %72 = vector.shape_cast %71 : vector<2x8x32xf32> to vector<16x32xf32>
    %c0_24 = arith.constant 0 : index
    %c0_25 = arith.constant 0 : index
    %c0_26 = arith.constant 0 : index
    %73 = vector.load %arg3[%c0_24, %c0_25, %c0_26] : memref<2x32x32xf32, #tpu.memory_space<vmem>>, vector<1x32x32xf32>
    %74 = vector.shape_cast %73 : vector<1x32x32xf32> to vector<32x32xf32>
    %cst_27 = arith.constant dense<0.000000e+00> : vector<16x32xf32>
    %75 = tpu.matmul %72, %74, %cst_27 {dimension_numbers = #tpu.dot_dimension_numbers<[1], [0], [0], [1], [0, 0, 1, 1], [], []>} : vector<16x32xf32>, vector<32x32xf32>, vector<16x32xf32> -> vector<16x32xf32>
    %c0_28 = arith.constant 0 : index
    %c0_29 = arith.constant 0 : index
    %c0_30 = arith.constant 0 : index
    %76 = vector.load %arg4[%c0_28, %c0_29, %c0_30] : memref<2x1x32xf32, #tpu.memory_space<vmem>>, vector<1x1x32xf32>
    %77 = vector.shape_cast %76 : vector<1x1x32xf32> to vector<1x32xf32>
    %78 = vector.broadcast %77 : vector<1x32xf32> to vector<16x32xf32>
    %79 = arith.addf %75, %78 : vector<16x32xf32>
    %80 = arith.addf %1, %79 : vector<16x32xf32>
    %c0_31 = arith.constant 0 : index
    %c0_32 = arith.constant 0 : index
    %c0_33 = arith.constant 0 : index
    %81 = vector.load %arg5[%c0_31, %c0_32, %c0_33] : memref<2x1x32xf32, #tpu.memory_space<vmem>>, vector<1x1x32xf32>
    %82 = vector.shape_cast %81 : vector<1x1x32xf32> to vector<1x32xf32>
    %c0_34 = arith.constant 0 : index
    %c0_35 = arith.constant 0 : index
    %c0_36 = arith.constant 0 : index
    %83 = vector.load %arg6[%c0_34, %c0_35, %c0_36] : memref<2x1x32xf32, #tpu.memory_space<vmem>>, vector<1x1x32xf32>
    %84 = vector.shape_cast %83 : vector<1x1x32xf32> to vector<1x32xf32>
    %cst_37 = arith.constant dense<0.000000e+00> : vector<16xf32>
    %85 = vector.multi_reduction <add>, %80, %cst_37 [1] : vector<16x32xf32> to vector<16xf32>
    %86 = vector.shape_cast %85 : vector<16xf32> to vector<16x1xf32>
    %cst_38 = arith.constant 3.200000e+01 : f32
    %87 = vector.broadcast %cst_38 : f32 to vector<16x1xf32>
    %88 = arith.divf %86, %87 : vector<16x1xf32>
    %89 = vector.broadcast %88 : vector<16x1xf32> to vector<16x32xf32>
    %90 = arith.subf %80, %89 : vector<16x32xf32>
    %91 = arith.mulf %90, %90 : vector<16x32xf32>
    %cst_39 = arith.constant dense<0.000000e+00> : vector<16xf32>
    %92 = vector.multi_reduction <add>, %91, %cst_39 [1] : vector<16x32xf32> to vector<16xf32>
    %93 = vector.shape_cast %92 : vector<16xf32> to vector<16x1xf32>
    %cst_40 = arith.constant 3.200000e+01 : f32
    %94 = vector.broadcast %cst_40 : f32 to vector<16x1xf32>
    %95 = arith.divf %93, %94 : vector<16x1xf32>
    %96 = vector.broadcast %88 : vector<16x1xf32> to vector<16x32xf32>
    %97 = arith.subf %80, %96 : vector<16x32xf32>
    %cst_41 = arith.constant 9.99999974E-6 : f32
    %98 = vector.broadcast %cst_41 : f32 to vector<16x1xf32>
    %99 = arith.addf %95, %98 : vector<16x1xf32>
    %100 = math.rsqrt %99 : vector<16x1xf32>
    %101 = vector.broadcast %100 : vector<16x1xf32> to vector<16x32xf32>
    %102 = arith.mulf %97, %101 : vector<16x32xf32>
    %103 = vector.broadcast %82 : vector<1x32xf32> to vector<16x32xf32>
    %104 = arith.mulf %102, %103 : vector<16x32xf32>
    %105 = vector.broadcast %84 : vector<1x32xf32> to vector<16x32xf32>
    %106 = arith.addf %104, %105 : vector<16x32xf32>
    %c0_42 = arith.constant 0 : index
    %c0_43 = arith.constant 0 : index
    %c0_44 = arith.constant 0 : index
    %107 = vector.load %arg7[%c0_42, %c0_43, %c0_44] : memref<2x32x64xf32, #tpu.memory_space<vmem>>, vector<1x32x64xf32>
    %108 = vector.shape_cast %107 : vector<1x32x64xf32> to vector<32x64xf32>
    %cst_45 = arith.constant dense<0.000000e+00> : vector<16x64xf32>
    %109 = tpu.matmul %106, %108, %cst_45 {dimension_numbers = #tpu.dot_dimension_numbers<[1], [0], [0], [1], [0, 0, 1, 1], [], []>} : vector<16x32xf32>, vector<32x64xf32>, vector<16x64xf32> -> vector<16x64xf32>
    %c0_46 = arith.constant 0 : index
    %c0_47 = arith.constant 0 : index
    %c0_48 = arith.constant 0 : index
    %110 = vector.load %arg8[%c0_46, %c0_47, %c0_48] : memref<2x1x64xf32, #tpu.memory_space<vmem>>, vector<1x1x64xf32>
    %111 = vector.shape_cast %110 : vector<1x1x64xf32> to vector<1x64xf32>
    %112 = vector.broadcast %111 : vector<1x64xf32> to vector<16x64xf32>
    %113 = arith.addf %109, %112 : vector<16x64xf32>
    %cst_49 = arith.constant 5.000000e-01 : f32
    %114 = vector.broadcast %cst_49 : f32 to vector<16x64xf32>
    %115 = arith.mulf %114, %113 : vector<16x64xf32>
    %cst_50 = arith.constant 1.41421354 : f32
    %116 = vector.broadcast %cst_50 : f32 to vector<16x64xf32>
    %117 = arith.divf %113, %116 : vector<16x64xf32>
    %118 = math.erf %117 : vector<16x64xf32>
    %cst_51 = arith.constant 1.000000e+00 : f32
    %119 = vector.broadcast %cst_51 : f32 to vector<16x64xf32>
    %120 = arith.addf %119, %118 : vector<16x64xf32>
    %121 = arith.mulf %115, %120 : vector<16x64xf32>
    %c0_52 = arith.constant 0 : index
    %c0_53 = arith.constant 0 : index
    %c0_54 = arith.constant 0 : index
    %122 = vector.load %arg9[%c0_52, %c0_53, %c0_54] : memref<2x64x32xf32, #tpu.memory_space<vmem>>, vector<1x64x32xf32>
    %123 = vector.shape_cast %122 : vector<1x64x32xf32> to vector<64x32xf32>
    %cst_55 = arith.constant dense<0.000000e+00> : vector<16x32xf32>
    %124 = tpu.matmul %121, %123, %cst_55 {dimension_numbers = #tpu.dot_dimension_numbers<[1], [0], [0], [1], [0, 0, 1, 1], [], []>} : vector<16x64xf32>, vector<64x32xf32>, vector<16x32xf32> -> vector<16x32xf32>
    %c0_56 = arith.constant 0 : index
    %c0_57 = arith.constant 0 : index
    %c0_58 = arith.constant 0 : index
    %125 = vector.load %arg10[%c0_56, %c0_57, %c0_58] : memref<2x1x32xf32, #tpu.memory_space<vmem>>, vector<1x1x32xf32>
    %126 = vector.shape_cast %125 : vector<1x1x32xf32> to vector<1x32xf32>
    %127 = vector.broadcast %126 : vector<1x32xf32> to vector<16x32xf32>
    %128 = arith.addf %124, %127 : vector<16x32xf32>
    %129 = arith.addf %106, %128 : vector<16x32xf32>
    %c0_59 = arith.constant 0 : index
    %c0_60 = arith.constant 0 : index
    %c0_61 = arith.constant 0 : index
    %130 = vector.load %arg11[%c0_59, %c0_60, %c0_61] : memref<2x1x32xf32, #tpu.memory_space<vmem>>, vector<1x1x32xf32>
    %131 = vector.shape_cast %130 : vector<1x1x32xf32> to vector<1x32xf32>
    %c0_62 = arith.constant 0 : index
    %c0_63 = arith.constant 0 : index
    %c0_64 = arith.constant 0 : index
    %132 = vector.load %arg12[%c0_62, %c0_63, %c0_64] : memref<2x1x32xf32, #tpu.memory_space<vmem>>, vector<1x1x32xf32>
    %133 = vector.shape_cast %132 : vector<1x1x32xf32> to vector<1x32xf32>
    %cst_65 = arith.constant dense<0.000000e+00> : vector<16xf32>
    %134 = vector.multi_reduction <add>, %129, %cst_65 [1] : vector<16x32xf32> to vector<16xf32>
    %135 = vector.shape_cast %134 : vector<16xf32> to vector<16x1xf32>
    %cst_66 = arith.constant 3.200000e+01 : f32
    %136 = vector.broadcast %cst_66 : f32 to vector<16x1xf32>
    %137 = arith.divf %135, %136 : vector<16x1xf32>
    %138 = vector.broadcast %137 : vector<16x1xf32> to vector<16x32xf32>
    %139 = arith.subf %129, %138 : vector<16x32xf32>
    %140 = arith.mulf %139, %139 : vector<16x32xf32>
    %cst_67 = arith.constant dense<0.000000e+00> : vector<16xf32>
    %141 = vector.multi_reduction <add>, %140, %cst_67 [1] : vector<16x32xf32> to vector<16xf32>
    %142 = vector.shape_cast %141 : vector<16xf32> to vector<16x1xf32>
    %cst_68 = arith.constant 3.200000e+01 : f32
    %143 = vector.broadcast %cst_68 : f32 to vector<16x1xf32>
    %144 = arith.divf %142, %143 : vector<16x1xf32>
    %145 = vector.broadcast %137 : vector<16x1xf32> to vector<16x32xf32>
    %146 = arith.subf %129, %145 : vector<16x32xf32>
    %cst_69 = arith.constant 9.99999974E-6 : f32
    %147 = vector.broadcast %cst_69 : f32 to vector<16x1xf32>
    %148 = arith.addf %144, %147 : vector<16x1xf32>
    %149 = math.rsqrt %148 : vector<16x1xf32>
    %150 = vector.broadcast %149 : vector<16x1xf32> to vector<16x32xf32>
    %151 = arith.mulf %146, %150 : vector<16x32xf32>
    %152 = vector.broadcast %131 : vector<1x32xf32> to vector<16x32xf32>
    %153 = arith.mulf %151, %152 : vector<16x32xf32>
    %154 = vector.broadcast %133 : vector<1x32xf32> to vector<16x32xf32>
    %155 = arith.addf %153, %154 : vector<16x32xf32>
    %c1 = arith.constant 1 : index
    %c0_70 = arith.constant 0 : index
    %c0_71 = arith.constant 0 : index
    %156 = vector.load %arg1[%c1, %c0_70, %c0_71] : memref<2x32x96xf32, #tpu.memory_space<vmem>>, vector<1x32x96xf32>
    %157 = vector.shape_cast %156 : vector<1x32x96xf32> to vector<32x96xf32>
    %cst_72 = arith.constant dense<0.000000e+00> : vector<16x96xf32>
    %158 = tpu.matmul %155, %157, %cst_72 {dimension_numbers = #tpu.dot_dimension_numbers<[1], [0], [0], [1], [0, 0, 1, 1], [], []>} : vector<16x32xf32>, vector<32x96xf32>, vector<16x96xf32> -> vector<16x96xf32>
    %c1_73 = arith.constant 1 : index
    %c0_74 = arith.constant 0 : index
    %c0_75 = arith.constant 0 : index
    %159 = vector.load %arg2[%c1_73, %c0_74, %c0_75] : memref<2x1x96xf32, #tpu.memory_space<vmem>>, vector<1x1x96xf32>
    %160 = vector.shape_cast %159 : vector<1x1x96xf32> to vector<1x96xf32>
    %161 = vector.broadcast %160 : vector<1x96xf32> to vector<16x96xf32>
    %162 = arith.addf %158, %161 : vector<16x96xf32>
    %163 = vector.extract_strided_slice %162 {offsets = [0, 0], sizes = [16, 32], strides = [1, 1]} : vector<16x96xf32> to vector<16x32xf32>
    %164 = vector.shape_cast %163 : vector<16x32xf32> to vector<2x8x32xf32>
    %165 = vector.extract_strided_slice %162 {offsets = [0, 32], sizes = [16, 32], strides = [1, 1]} : vector<16x96xf32> to vector<16x32xf32>
    %166 = vector.shape_cast %165 : vector<16x32xf32> to vector<2x8x32xf32>
    %167 = vector.extract_strided_slice %162 {offsets = [0, 64], sizes = [16, 32], strides = [1, 1]} : vector<16x96xf32> to vector<16x32xf32>
    %168 = vector.shape_cast %167 : vector<16x32xf32> to vector<2x8x32xf32>
    %169 = vector.extract_strided_slice %164 {offsets = [0, 0, 0], sizes = [2, 8, 8], strides = [1, 1, 1]} : vector<2x8x32xf32> to vector<2x8x8xf32>
    %170 = vector.extract_strided_slice %166 {offsets = [0, 0, 0], sizes = [2, 8, 8], strides = [1, 1, 1]} : vector<2x8x32xf32> to vector<2x8x8xf32>
    %171 = vector.extract_strided_slice %168 {offsets = [0, 0, 0], sizes = [2, 8, 8], strides = [1, 1, 1]} : vector<2x8x32xf32> to vector<2x8x8xf32>
    "tpu.trace_start"() <{level = 10 : i32, message = "bqd,bkd->bqk"}> : () -> ()
    %cst_76 = arith.constant dense<0.000000e+00> : vector<2x8x8xf32>
    %172 = tpu.matmul %169, %170, %cst_76 {dimension_numbers = #tpu.dot_dimension_numbers<[2], [2], [1], [1], [0, 0, 0, 1, 1, 1], [0], [0]>} : vector<2x8x8xf32>, vector<2x8x8xf32>, vector<2x8x8xf32> -> vector<2x8x8xf32>
    "tpu.trace_stop"() : () -> ()
    %cst_77 = arith.constant dense<0xFF800000> : vector<2x8xf32>
    %173 = vector.multi_reduction <maximumf>, %172, %cst_77 [2] : vector<2x8x8xf32> to vector<2x8xf32>
    %174 = vector.shape_cast %173 : vector<2x8xf32> to vector<2x8x1xf32>
    %175 = vector.broadcast %174 : vector<2x8x1xf32> to vector<2x8x8xf32>
    %176 = arith.subf %172, %175 : vector<2x8x8xf32>
    %177 = math.exp %176 : vector<2x8x8xf32>
    %cst_78 = arith.constant dense<0.000000e+00> : vector<2x8xf32>
    %178 = vector.multi_reduction <add>, %177, %cst_78 [2] : vector<2x8x8xf32> to vector<2x8xf32>
    %179 = vector.shape_cast %178 : vector<2x8xf32> to vector<2x8x1xf32>
    %180 = vector.broadcast %179 : vector<2x8x1xf32> to vector<2x8x8xf32>
    %181 = arith.divf %177, %180 : vector<2x8x8xf32>
    "tpu.trace_start"() <{level = 10 : i32, message = "bqk,bkd->bqd"}> : () -> ()
    %cst_79 = arith.constant dense<0.000000e+00> : vector<2x8x8xf32>
    %182 = tpu.matmul %181, %171, %cst_79 {dimension_numbers = #tpu.dot_dimension_numbers<[2], [1], [1], [2], [0, 0, 0, 1, 1, 2], [0], [0]>} : vector<2x8x8xf32>, vector<2x8x8xf32>, vector<2x8x8xf32> -> vector<2x8x8xf32>
    "tpu.trace_stop"() : () -> ()
    %183 = vector.extract_strided_slice %164 {offsets = [0, 0, 8], sizes = [2, 8, 8], strides = [1, 1, 1]} : vector<2x8x32xf32> to vector<2x8x8xf32>
    %184 = vector.extract_strided_slice %166 {offsets = [0, 0, 8], sizes = [2, 8, 8], strides = [1, 1, 1]} : vector<2x8x32xf32> to vector<2x8x8xf32>
    %185 = vector.extract_strided_slice %168 {offsets = [0, 0, 8], sizes = [2, 8, 8], strides = [1, 1, 1]} : vector<2x8x32xf32> to vector<2x8x8xf32>
    "tpu.trace_start"() <{level = 10 : i32, message = "bqd,bkd->bqk"}> : () -> ()
    %cst_80 = arith.constant dense<0.000000e+00> : vector<2x8x8xf32>
    %186 = tpu.matmul %183, %184, %cst_80 {dimension_numbers = #tpu.dot_dimension_numbers<[2], [2], [1], [1], [0, 0, 0, 1, 1, 1], [0], [0]>} : vector<2x8x8xf32>, vector<2x8x8xf32>, vector<2x8x8xf32> -> vector<2x8x8xf32>
    "tpu.trace_stop"() : () -> ()
    %cst_81 = arith.constant dense<0xFF800000> : vector<2x8xf32>
    %187 = vector.multi_reduction <maximumf>, %186, %cst_81 [2] : vector<2x8x8xf32> to vector<2x8xf32>
    %188 = vector.shape_cast %187 : vector<2x8xf32> to vector<2x8x1xf32>
    %189 = vector.broadcast %188 : vector<2x8x1xf32> to vector<2x8x8xf32>
    %190 = arith.subf %186, %189 : vector<2x8x8xf32>
    %191 = math.exp %190 : vector<2x8x8xf32>
    %cst_82 = arith.constant dense<0.000000e+00> : vector<2x8xf32>
    %192 = vector.multi_reduction <add>, %191, %cst_82 [2] : vector<2x8x8xf32> to vector<2x8xf32>
    %193 = vector.shape_cast %192 : vector<2x8xf32> to vector<2x8x1xf32>
    %194 = vector.broadcast %193 : vector<2x8x1xf32> to vector<2x8x8xf32>
    %195 = arith.divf %191, %194 : vector<2x8x8xf32>
    "tpu.trace_start"() <{level = 10 : i32, message = "bqk,bkd->bqd"}> : () -> ()
    %cst_83 = arith.constant dense<0.000000e+00> : vector<2x8x8xf32>
    %196 = tpu.matmul %195, %185, %cst_83 {dimension_numbers = #tpu.dot_dimension_numbers<[2], [1], [1], [2], [0, 0, 0, 1, 1, 2], [0], [0]>} : vector<2x8x8xf32>, vector<2x8x8xf32>, vector<2x8x8xf32> -> vector<2x8x8xf32>
    "tpu.trace_stop"() : () -> ()
    %197 = vector.extract_strided_slice %164 {offsets = [0, 0, 16], sizes = [2, 8, 8], strides = [1, 1, 1]} : vector<2x8x32xf32> to vector<2x8x8xf32>
    %198 = vector.extract_strided_slice %166 {offsets = [0, 0, 16], sizes = [2, 8, 8], strides = [1, 1, 1]} : vector<2x8x32xf32> to vector<2x8x8xf32>
    %199 = vector.extract_strided_slice %168 {offsets = [0, 0, 16], sizes = [2, 8, 8], strides = [1, 1, 1]} : vector<2x8x32xf32> to vector<2x8x8xf32>
    "tpu.trace_start"() <{level = 10 : i32, message = "bqd,bkd->bqk"}> : () -> ()
    %cst_84 = arith.constant dense<0.000000e+00> : vector<2x8x8xf32>
    %200 = tpu.matmul %197, %198, %cst_84 {dimension_numbers = #tpu.dot_dimension_numbers<[2], [2], [1], [1], [0, 0, 0, 1, 1, 1], [0], [0]>} : vector<2x8x8xf32>, vector<2x8x8xf32>, vector<2x8x8xf32> -> vector<2x8x8xf32>
    "tpu.trace_stop"() : () -> ()
    %cst_85 = arith.constant dense<0xFF800000> : vector<2x8xf32>
    %201 = vector.multi_reduction <maximumf>, %200, %cst_85 [2] : vector<2x8x8xf32> to vector<2x8xf32>
    %202 = vector.shape_cast %201 : vector<2x8xf32> to vector<2x8x1xf32>
    %203 = vector.broadcast %202 : vector<2x8x1xf32> to vector<2x8x8xf32>
    %204 = arith.subf %200, %203 : vector<2x8x8xf32>
    %205 = math.exp %204 : vector<2x8x8xf32>
    %cst_86 = arith.constant dense<0.000000e+00> : vector<2x8xf32>
    %206 = vector.multi_reduction <add>, %205, %cst_86 [2] : vector<2x8x8xf32> to vector<2x8xf32>
    %207 = vector.shape_cast %206 : vector<2x8xf32> to vector<2x8x1xf32>
    %208 = vector.broadcast %207 : vector<2x8x1xf32> to vector<2x8x8xf32>
    %209 = arith.divf %205, %208 : vector<2x8x8xf32>
    "tpu.trace_start"() <{level = 10 : i32, message = "bqk,bkd->bqd"}> : () -> ()
    %cst_87 = arith.constant dense<0.000000e+00> : vector<2x8x8xf32>
    %210 = tpu.matmul %209, %199, %cst_87 {dimension_numbers = #tpu.dot_dimension_numbers<[2], [1], [1], [2], [0, 0, 0, 1, 1, 2], [0], [0]>} : vector<2x8x8xf32>, vector<2x8x8xf32>, vector<2x8x8xf32> -> vector<2x8x8xf32>
    "tpu.trace_stop"() : () -> ()
    %211 = vector.extract_strided_slice %164 {offsets = [0, 0, 24], sizes = [2, 8, 8], strides = [1, 1, 1]} : vector<2x8x32xf32> to vector<2x8x8xf32>
    %212 = vector.extract_strided_slice %166 {offsets = [0, 0, 24], sizes = [2, 8, 8], strides = [1, 1, 1]} : vector<2x8x32xf32> to vector<2x8x8xf32>
    %213 = vector.extract_strided_slice %168 {offsets = [0, 0, 24], sizes = [2, 8, 8], strides = [1, 1, 1]} : vector<2x8x32xf32> to vector<2x8x8xf32>
    "tpu.trace_start"() <{level = 10 : i32, message = "bqd,bkd->bqk"}> : () -> ()
    %cst_88 = arith.constant dense<0.000000e+00> : vector<2x8x8xf32>
    %214 = tpu.matmul %211, %212, %cst_88 {dimension_numbers = #tpu.dot_dimension_numbers<[2], [2], [1], [1], [0, 0, 0, 1, 1, 1], [0], [0]>} : vector<2x8x8xf32>, vector<2x8x8xf32>, vector<2x8x8xf32> -> vector<2x8x8xf32>
    "tpu.trace_stop"() : () -> ()
    %cst_89 = arith.constant dense<0xFF800000> : vector<2x8xf32>
    %215 = vector.multi_reduction <maximumf>, %214, %cst_89 [2] : vector<2x8x8xf32> to vector<2x8xf32>
    %216 = vector.shape_cast %215 : vector<2x8xf32> to vector<2x8x1xf32>
    %217 = vector.broadcast %216 : vector<2x8x1xf32> to vector<2x8x8xf32>
    %218 = arith.subf %214, %217 : vector<2x8x8xf32>
    %219 = math.exp %218 : vector<2x8x8xf32>
    %cst_90 = arith.constant dense<0.000000e+00> : vector<2x8xf32>
    %220 = vector.multi_reduction <add>, %219, %cst_90 [2] : vector<2x8x8xf32> to vector<2x8xf32>
    %221 = vector.shape_cast %220 : vector<2x8xf32> to vector<2x8x1xf32>
    %222 = vector.broadcast %221 : vector<2x8x1xf32> to vector<2x8x8xf32>
    %223 = arith.divf %219, %222 : vector<2x8x8xf32>
    "tpu.trace_start"() <{level = 10 : i32, message = "bqk,bkd->bqd"}> : () -> ()
    %cst_91 = arith.constant dense<0.000000e+00> : vector<2x8x8xf32>
    %224 = tpu.matmul %223, %213, %cst_91 {dimension_numbers = #tpu.dot_dimension_numbers<[2], [1], [1], [2], [0, 0, 0, 1, 1, 2], [0], [0]>} : vector<2x8x8xf32>, vector<2x8x8xf32>, vector<2x8x8xf32> -> vector<2x8x8xf32>
    "tpu.trace_stop"() : () -> ()
    %225 = tpu.concatenate %182, %196, %210, %224 in 2 : vector<2x8x8xf32>, vector<2x8x8xf32>, vector<2x8x8xf32>, vector<2x8x8xf32> -> vector<2x8x32xf32>
    %226 = vector.shape_cast %225 : vector<2x8x32xf32> to vector<16x32xf32>
    %c1_92 = arith.constant 1 : index
    %c0_93 = arith.constant 0 : index
    %c0_94 = arith.constant 0 : index
    %227 = vector.load %arg3[%c1_92, %c0_93, %c0_94] : memref<2x32x32xf32, #tpu.memory_space<vmem>>, vector<1x32x32xf32>
    %228 = vector.shape_cast %227 : vector<1x32x32xf32> to vector<32x32xf32>
    %cst_95 = arith.constant dense<0.000000e+00> : vector<16x32xf32>
    %229 = tpu.matmul %226, %228, %cst_95 {dimension_numbers = #tpu.dot_dimension_numbers<[1], [0], [0], [1], [0, 0, 1, 1], [], []>} : vector<16x32xf32>, vector<32x32xf32>, vector<16x32xf32> -> vector<16x32xf32>
    %c1_96 = arith.constant 1 : index
    %c0_97 = arith.constant 0 : index
    %c0_98 = arith.constant 0 : index
    %230 = vector.load %arg4[%c1_96, %c0_97, %c0_98] : memref<2x1x32xf32, #tpu.memory_space<vmem>>, vector<1x1x32xf32>
    %231 = vector.shape_cast %230 : vector<1x1x32xf32> to vector<1x32xf32>
    %232 = vector.broadcast %231 : vector<1x32xf32> to vector<16x32xf32>
    %233 = arith.addf %229, %232 : vector<16x32xf32>
    %234 = arith.addf %155, %233 : vector<16x32xf32>
    %c1_99 = arith.constant 1 : index
    %c0_100 = arith.constant 0 : index
    %c0_101 = arith.constant 0 : index
    %235 = vector.load %arg5[%c1_99, %c0_100, %c0_101] : memref<2x1x32xf32, #tpu.memory_space<vmem>>, vector<1x1x32xf32>
    %236 = vector.shape_cast %235 : vector<1x1x32xf32> to vector<1x32xf32>
    %c1_102 = arith.constant 1 : index
    %c0_103 = arith.constant 0 : index
    %c0_104 = arith.constant 0 : index
    %237 = vector.load %arg6[%c1_102, %c0_103, %c0_104] : memref<2x1x32xf32, #tpu.memory_space<vmem>>, vector<1x1x32xf32>
    %238 = vector.shape_cast %237 : vector<1x1x32xf32> to vector<1x32xf32>
    %cst_105 = arith.constant dense<0.000000e+00> : vector<16xf32>
    %239 = vector.multi_reduction <add>, %234, %cst_105 [1] : vector<16x32xf32> to vector<16xf32>
    %240 = vector.shape_cast %239 : vector<16xf32> to vector<16x1xf32>
    %cst_106 = arith.constant 3.200000e+01 : f32
    %241 = vector.broadcast %cst_106 : f32 to vector<16x1xf32>
    %242 = arith.divf %240, %241 : vector<16x1xf32>
    %243 = vector.broadcast %242 : vector<16x1xf32> to vector<16x32xf32>
    %244 = arith.subf %234, %243 : vector<16x32xf32>
    %245 = arith.mulf %244, %244 : vector<16x32xf32>
    %cst_107 = arith.constant dense<0.000000e+00> : vector<16xf32>
    %246 = vector.multi_reduction <add>, %245, %cst_107 [1] : vector<16x32xf32> to vector<16xf32>
    %247 = vector.shape_cast %246 : vector<16xf32> to vector<16x1xf32>
    %cst_108 = arith.constant 3.200000e+01 : f32
    %248 = vector.broadcast %cst_108 : f32 to vector<16x1xf32>
    %249 = arith.divf %247, %248 : vector<16x1xf32>
    %250 = vector.broadcast %242 : vector<16x1xf32> to vector<16x32xf32>
    %251 = arith.subf %234, %250 : vector<16x32xf32>
    %cst_109 = arith.constant 9.99999974E-6 : f32
    %252 = vector.broadcast %cst_109 : f32 to vector<16x1xf32>
    %253 = arith.addf %249, %252 : vector<16x1xf32>
    %254 = math.rsqrt %253 : vector<16x1xf32>
    %255 = vector.broadcast %254 : vector<16x1xf32> to vector<16x32xf32>
    %256 = arith.mulf %251, %255 : vector<16x32xf32>
    %257 = vector.broadcast %236 : vector<1x32xf32> to vector<16x32xf32>
    %258 = arith.mulf %256, %257 : vector<16x32xf32>
    %259 = vector.broadcast %238 : vector<1x32xf32> to vector<16x32xf32>
    %260 = arith.addf %258, %259 : vector<16x32xf32>
    %c1_110 = arith.constant 1 : index
    %c0_111 = arith.constant 0 : index
    %c0_112 = arith.constant 0 : index
    %261 = vector.load %arg7[%c1_110, %c0_111, %c0_112] : memref<2x32x64xf32, #tpu.memory_space<vmem>>, vector<1x32x64xf32>
    %262 = vector.shape_cast %261 : vector<1x32x64xf32> to vector<32x64xf32>
    %cst_113 = arith.constant dense<0.000000e+00> : vector<16x64xf32>
    %263 = tpu.matmul %260, %262, %cst_113 {dimension_numbers = #tpu.dot_dimension_numbers<[1], [0], [0], [1], [0, 0, 1, 1], [], []>} : vector<16x32xf32>, vector<32x64xf32>, vector<16x64xf32> -> vector<16x64xf32>
    %c1_114 = arith.constant 1 : index
    %c0_115 = arith.constant 0 : index
    %c0_116 = arith.constant 0 : index
    %264 = vector.load %arg8[%c1_114, %c0_115, %c0_116] : memref<2x1x64xf32, #tpu.memory_space<vmem>>, vector<1x1x64xf32>
    %265 = vector.shape_cast %264 : vector<1x1x64xf32> to vector<1x64xf32>
    %266 = vector.broadcast %265 : vector<1x64xf32> to vector<16x64xf32>
    %267 = arith.addf %263, %266 : vector<16x64xf32>
    %cst_117 = arith.constant 5.000000e-01 : f32
    %268 = vector.broadcast %cst_117 : f32 to vector<16x64xf32>
    %269 = arith.mulf %268, %267 : vector<16x64xf32>
    %cst_118 = arith.constant 1.41421354 : f32
    %270 = vector.broadcast %cst_118 : f32 to vector<16x64xf32>
    %271 = arith.divf %267, %270 : vector<16x64xf32>
    %272 = math.erf %271 : vector<16x64xf32>
    %cst_119 = arith.constant 1.000000e+00 : f32
    %273 = vector.broadcast %cst_119 : f32 to vector<16x64xf32>
    %274 = arith.addf %273, %272 : vector<16x64xf32>
    %275 = arith.mulf %269, %274 : vector<16x64xf32>
    %c1_120 = arith.constant 1 : index
    %c0_121 = arith.constant 0 : index
    %c0_122 = arith.constant 0 : index
    %276 = vector.load %arg9[%c1_120, %c0_121, %c0_122] : memref<2x64x32xf32, #tpu.memory_space<vmem>>, vector<1x64x32xf32>
    %277 = vector.shape_cast %276 : vector<1x64x32xf32> to vector<64x32xf32>
    %cst_123 = arith.constant dense<0.000000e+00> : vector<16x32xf32>
    %278 = tpu.matmul %275, %277, %cst_123 {dimension_numbers = #tpu.dot_dimension_numbers<[1], [0], [0], [1], [0, 0, 1, 1], [], []>} : vector<16x64xf32>, vector<64x32xf32>, vector<16x32xf32> -> vector<16x32xf32>
    %c1_124 = arith.constant 1 : index
    %c0_125 = arith.constant 0 : index
    %c0_126 = arith.constant 0 : index
    %279 = vector.load %arg10[%c1_124, %c0_125, %c0_126] : memref<2x1x32xf32, #tpu.memory_space<vmem>>, vector<1x1x32xf32>
    %280 = vector.shape_cast %279 : vector<1x1x32xf32> to vector<1x32xf32>
    %281 = vector.broadcast %280 : vector<1x32xf32> to vector<16x32xf32>
    %282 = arith.addf %278, %281 : vector<16x32xf32>
    %283 = arith.addf %260, %282 : vector<16x32xf32>
    %c1_127 = arith.constant 1 : index
    %c0_128 = arith.constant 0 : index
    %c0_129 = arith.constant 0 : index
    %284 = vector.load %arg11[%c1_127, %c0_128, %c0_129] : memref<2x1x32xf32, #tpu.memory_space<vmem>>, vector<1x1x32xf32>
    %285 = vector.shape_cast %284 : vector<1x1x32xf32> to vector<1x32xf32>
    %c1_130 = arith.constant 1 : index
    %c0_131 = arith.constant 0 : index
    %c0_132 = arith.constant 0 : index
    %286 = vector.load %arg12[%c1_130, %c0_131, %c0_132] : memref<2x1x32xf32, #tpu.memory_space<vmem>>, vector<1x1x32xf32>
    %287 = vector.shape_cast %286 : vector<1x1x32xf32> to vector<1x32xf32>
    %cst_133 = arith.constant dense<0.000000e+00> : vector<16xf32>
    %288 = vector.multi_reduction <add>, %283, %cst_133 [1] : vector<16x32xf32> to vector<16xf32>
    %289 = vector.shape_cast %288 : vector<16xf32> to vector<16x1xf32>
    %cst_134 = arith.constant 3.200000e+01 : f32
    %290 = vector.broadcast %cst_134 : f32 to vector<16x1xf32>
    %291 = arith.divf %289, %290 : vector<16x1xf32>
    %292 = vector.broadcast %291 : vector<16x1xf32> to vector<16x32xf32>
    %293 = arith.subf %283, %292 : vector<16x32xf32>
    %294 = arith.mulf %293, %293 : vector<16x32xf32>
    %cst_135 = arith.constant dense<0.000000e+00> : vector<16xf32>
    %295 = vector.multi_reduction <add>, %294, %cst_135 [1] : vector<16x32xf32> to vector<16xf32>
    %296 = vector.shape_cast %295 : vector<16xf32> to vector<16x1xf32>
    %cst_136 = arith.constant 3.200000e+01 : f32
    %297 = vector.broadcast %cst_136 : f32 to vector<16x1xf32>
    %298 = arith.divf %296, %297 : vector<16x1xf32>
    %299 = vector.broadcast %291 : vector<16x1xf32> to vector<16x32xf32>
    %300 = arith.subf %283, %299 : vector<16x32xf32>
    %cst_137 = arith.constant 9.99999974E-6 : f32
    %301 = vector.broadcast %cst_137 : f32 to vector<16x1xf32>
    %302 = arith.addf %298, %301 : vector<16x1xf32>
    %303 = math.rsqrt %302 : vector<16x1xf32>
    %304 = vector.broadcast %303 : vector<16x1xf32> to vector<16x32xf32>
    %305 = arith.mulf %300, %304 : vector<16x32xf32>
    %306 = vector.broadcast %285 : vector<1x32xf32> to vector<16x32xf32>
    %307 = arith.mulf %305, %306 : vector<16x32xf32>
    %308 = vector.broadcast %287 : vector<1x32xf32> to vector<16x32xf32>
    %309 = arith.addf %307, %308 : vector<16x32xf32>
    %310 = vector.shape_cast %309 : vector<16x32xf32> to vector<2x8x32xf32>
    %cst_138 = arith.constant dense<0.000000e+00> : vector<2x32xf32>
    %311 = vector.multi_reduction <add>, %310, %cst_138 [1] : vector<2x8x32xf32> to vector<2x32xf32>
    %cst_139 = arith.constant 8.000000e+00 : f32
    %312 = vector.broadcast %cst_139 : f32 to vector<2x32xf32>
    %313 = arith.divf %311, %312 : vector<2x32xf32>
    %cst_140 = arith.constant dense<0xFF800000> : vector<2x32xf32>
    %314 = vector.multi_reduction <maximumf>, %310, %cst_140 [1] : vector<2x8x32xf32> to vector<2x32xf32>
    %315 = arith.mulf %310, %310 : vector<2x8x32xf32>
    %cst_141 = arith.constant dense<0.000000e+00> : vector<2x8xf32>
    %316 = vector.multi_reduction <add>, %315, %cst_141 [2] : vector<2x8x32xf32> to vector<2x8xf32>
    %317 = vector.shape_cast %316 : vector<2x8xf32> to vector<2x8x1xf32>
    %318 = math.sqrt %317 : vector<2x8x1xf32>
    %cst_142 = arith.constant dense<0xFF800000> : vector<2x1xf32>
    %319 = vector.multi_reduction <maximumf>, %318, %cst_142 [1] : vector<2x8x1xf32> to vector<2x1xf32>
    %320 = vector.shape_cast %319 : vector<2x1xf32> to vector<2x1x1xf32>
    %321 = vector.broadcast %320 : vector<2x1x1xf32> to vector<2x8x1xf32>
    %322 = arith.subf %318, %321 : vector<2x8x1xf32>
    %323 = math.exp %322 : vector<2x8x1xf32>
    %cst_143 = arith.constant dense<0.000000e+00> : vector<2x1xf32>
    %324 = vector.multi_reduction <add>, %323, %cst_143 [1] : vector<2x8x1xf32> to vector<2x1xf32>
    %325 = vector.shape_cast %324 : vector<2x1xf32> to vector<2x1x1xf32>
    %326 = vector.broadcast %325 : vector<2x1x1xf32> to vector<2x8x1xf32>
    %327 = arith.divf %323, %326 : vector<2x8x1xf32>
    %328 = vector.broadcast %327 : vector<2x8x1xf32> to vector<2x8x32xf32>
    %329 = arith.mulf %310, %328 : vector<2x8x32xf32>
    %cst_144 = arith.constant dense<0.000000e+00> : vector<2x32xf32>
    %330 = vector.multi_reduction <add>, %329, %cst_144 [1] : vector<2x8x32xf32> to vector<2x32xf32>
    %331 = arith.addf %313, %314 : vector<2x32xf32>
    %332 = arith.addf %331, %330 : vector<2x32xf32>
    %c0_145 = arith.constant 0 : index
    %c0_146 = arith.constant 0 : index
    %333 = vector.load %arg13[%c0_145, %c0_146] : memref<32x128xf32, #tpu.memory_space<vmem>>, vector<32x128xf32>
    %cst_147 = arith.constant dense<0.000000e+00> : vector<2x128xf32>
    %334 = tpu.matmul %332, %333, %cst_147 {dimension_numbers = #tpu.dot_dimension_numbers<[1], [0], [0], [1], [0, 0, 1, 1], [], []>} : vector<2x32xf32>, vector<32x128xf32>, vector<2x128xf32> -> vector<2x128xf32>
    %c0_148 = arith.constant 0 : index
    %c0_149 = arith.constant 0 : index
    %335 = vector.load %arg14[%c0_148, %c0_149] : memref<1x128xf32, #tpu.memory_space<vmem>>, vector<1x128xf32>
    %336 = vector.broadcast %335 : vector<1x128xf32> to vector<2x128xf32>
    %337 = arith.addf %334, %336 : vector<2x128xf32>
    %c0_150 = arith.constant 0 : index
    %c0_151 = arith.constant 0 : index
    %338 = vector.load %arg15[%c0_150, %c0_151] : memref<2x128xf32, #tpu.memory_space<vmem>>, vector<2x128xf32>
    tpu.vector_store %arg15[%c0_150, %c0_151], %337 {strides = array<i32>} : memref<2x128xf32, #tpu.memory_space<vmem>>, vector<2x128xf32>,
    return
  }
}

</mosaic_0001>

<bundles_post_ra>
// kernel: tpu_custom_call.1
= control target key start
LH: loop header
LB: loop body
LE: loop exit
PB: predicated region body
PF: predicated region fallthrough
CT: control target
= control target key end

     0   :  { %20 = vsyncpa [#allocation3], 0  ;;  %s5334_s0 = inlined_call_operand.hbm [shape: f32[2,8,32], index: 0, kind: input, shape index: {}]   ;;  %s5335_s1 = inlined_call_operand.vmem [shape: f32[2,32,96], index: 1, kind: input, shape index: {}]   ;;  %s5336_s2 = inlined_call_operand.vmem [shape: f32[2,1,96], index: 2, kind: input, shape index: {}]   ;;  %s5337_s3 = inlined_call_operand.vmem [shape: f32[2,32,32], index: 3, kind: input, shape index: {}]   ;;  %s5338_s4 = inlined_call_operand.vmem [shape: f32[2,1,32], index: 4, kind: input, shape index: {}]   ;;  %s5339_s5 = inlined_call_operand.vmem [shape: f32[2,1,32], index: 5, kind: input, shape index: {}]   ;;  %s5340_s6 = inlined_call_operand.vmem [shape: f32[2,1,32], index: 6, kind: input, shape index: {}]   ;;  %s5341_s7 = inlined_call_operand.vmem [shape: f32[2,32,64], index: 7, kind: input, shape index: {}]   ;;  %s5342_s8 = inlined_call_operand.vmem [shape: f32[2,1,64], index: 8, kind: input, shape index: {}]   ;;  %s5343_s9 = inlined_call_operand.vmem [shape: f32[2,64,32], index: 9, kind: input, shape index: {}]   ;;  %s5344_s10 = inlined_call_operand.vmem [shape: f32[2,1,32], index: 10, kind: input, shape index: {}]   ;;  %s5345_s11 = inlined_call_operand.vmem [shape: f32[2,1,32], index: 11, kind: input, shape index: {}]   ;;  %s5346_s12 = inlined_call_operand.vmem [shape: f32[2,1,32], index: 12, kind: input, shape index: {}]   ;;  %s5347_s13 = inlined_call_operand.hbm [shape: f32[32,128], index: 13, kind: input, shape index: {}]   ;;  %s5348_s14 = inlined_call_operand.vmem [shape: f32[1,128], index: 14, kind: input, shape index: {}]   ;;  %s5349_s15 = inlined_call_operand.hbm [shape: f32[2,128], index: 15, kind: output, shape index: {}]  }
   0x1   :  { %21 = vsyncpa [#allocation6], 0 }
   0x2   :  { %22 = vsyncpa [#allocation4], 0  ;;  %s4651_s18 = smov [#allocation2]  }
   0x3   :  { %s28_s19 = sshll.u32 %s4651_s18, 4  ;;  %s29_s19 = int_to_ptr.vmem [resolvable:$true] %s28_s19 }
   0x4   :  { %s4593_s20 = scalar_lea.vmem %s29_s19, 256  ;;  %p4598_p1 = scmp.lt.s32.totalorder %s29_s19, %s29_s19 }
   0x5   :  { %p4594_p0 = scmp.ne.s32.totalorder %s29_s19, %s4593_s20  ;;  %p4599_p2 = scmp.lt.s32.totalorder %s4593_s20, %s4593_s20 }
   0x7   :  { %p4600_p3 = por %p4599_p2, %p4598_p1 }
   0x9   :  { %p4601_p4 = pnand %p4600_p3, %p4594_p0 }
   0xb   :  { %4604 = shalt.err (!%p4601_p4)
}
   0xc   :  { %s4652_s21 = smov 128   ;;  %s5352_s22 = smov 8  }
   0xd   :  { %34 = dma.hbm_to_vmem [thread:$0]  %s5334_s0, 256, %s29_s19, [#allocation3], %s4652_s21, %s4652_s21, %s5352_s22  }
   0xe   :  { %s4654_s25 = smov [#allocation5]  }
   0xf   :  { %s64_s26 = sshll.u32 %s4654_s25, 4  ;;  %s65_s26 = int_to_ptr.vmem [resolvable:$true] %s64_s26 }
  0x10   :  { %s4613_s27 = scalar_lea.vmem %s65_s26, 512  ;;  %p4618_p6 = scmp.lt.s32.totalorder %s65_s26, %s65_s26 }
  0x11   :  { %p4614_p5 = scmp.ne.s32.totalorder %s65_s26, %s4613_s27  ;;  %p4619_p7 = scmp.lt.s32.totalorder %s4613_s27, %s4613_s27 }
  0x13   :  { %p4620_p8 = por %p4619_p7, %p4618_p6 }
  0x15   :  { %p4621_p9 = pnand %p4620_p8, %p4614_p5 }
  0x17   :  { %4624 = shalt.err (!%p4621_p9)
}
  0x18   :  { %70 = dma.hbm_to_vmem [thread:$0]  %s5347_s13, 512, %s65_s26, [#allocation6], %s4652_s21, %s4652_s21, %s5352_s22  }
  0x19   :  { %4645 = dma.done.wait [#allocation3], 256  }
  0x1a   :  { %4646 = vsyncadd [#allocation3], 4294967040 }
  0x1b   :  { %4647 = dma.done.wait [#allocation6], 512  }
  0x1c   :  { %4648 = vsyncadd [#allocation6], 4294966784  ;;  %vm92_vm0 = vcmask 261120   ;;  %v84_v0 = vld [vmem:[%s5335_s1 + $0x18] sm:$0xff]  ;;  %v83_v1 = vld [vmem:[%s5335_s1 + $0x10] sm:$0xff]  ;;  %v4655_v6 = vmov 0.0  }
  0x1d   :  { %4190 = vmatprep.subr.mxu0 %v84_v0  ;;  %v4765_v2 = vld [vmem:[#allocation2] sm:$0xff]  ;;  %v82_v3 = vld [vmem:[%s5335_s1 + $0x8] sm:$0xff]  ;;  %4201 = vmatprep.subr.mxu1 %v4655_v6  ;;  %vm4656_vm1 = vmmov 0   ;;  %s4657_s24 = smov 96   ;;  %vm177_vm2 = vcmask 64512   ;;  %s4658_s25 = smov 64  }
  0x1e   :  { %4191 = vmatpush3.msra.mxu0 %v84_v0  ;;  %4198 = vmatprep.mubr.msk.f32.mxu0 %vm92_vm0, %v4765_v2  ;;  %v81_v4 = vld [vmem:[%s5335_s1] sm:$0xff]  ;;  %v4775_v5 = vld [vmem:[#allocation2 + $0x8] sm:$0xff]  ;;  %s4659_s26 = smov 88   ;;  %s4660_s27 = smov 120   ;;  %vm1522_vm3 = vcmask 195584   ;;  %vm1519_vm4 = vcmask 130048  }
  0x1f   :  { %4192 = vmatprep.subr.mxu0 %v83_v1  ;;  %4203 = vmatprep.mubr.msk.f32.mxu1 %vm4656_vm1, %v4655_v6  ;;  %v3955_v8 = vld [vmem:[%s5336_s2] ss:$0 sm:$0xff]  ;;  %s4661_s28 = smov 56   ;;  %s4662_s29 = smov 112   ;;  %vm1782_vm5 = vcmask 523264   ;;  %vm3864_vm10 = vcmask 1041409  }
  0x20   :  { %4193 = vmatpush3.msra.mxu0 %v83_v1  ;;  %s4663_s0 = smov 80   ;;  %s4664_s30 = smov 48  }
  0x21   :  { %4194 = vmatprep.subr.mxu0 %v82_v3  ;;  %s4665_s16 = smov 72   ;;  %s5356_s17 = smov 104  }
  0x22   :  { %4195 = vmatpush3.msra.mxu0 %v82_v3  ;;  %s5354_s18 = smov 40   ;;  %s5350_s19 = smov 16  }
  0x23   :  { %4196 = vmatprep.subr.mxu0 %v81_v4  ;;  %s5358_s13 = smov 24  }
  0x24   :  { %4197 = vmatpush3.msra.mxu0 %v81_v4 }
  0x25   :  { %4199 = vmatmul.mubr.msk.f32.vlgmr.msra.gmra.mxu0 %vm92_vm0, %v4775_v5  ;;  %4221 = vmatprep.subr.mxu0 %v4655_v6 }
  0x26   :  { %4223 = vmatprep.mubr.msk.f32.mxu0 %vm4656_vm1, %v4655_v6 }
  0xe5   :  { %v4200_v7 = vpop.f32.mrf.mxu0 }
  0xe6   :  { %v4792_v11 = vadd.f32 %v4200_v7, %v3955_v8 }
  0xe7   :  { %v165_v9 = vpop.f32.mrf.mxu0 }
  0xe8   :  { %v4788_v10 = vadd.f32 %v3955_v8, %v165_v9 }
  0xea   :  { %175 = vrot.lane.b32.xlu0 %v4788_v10, %s4657_s24 }
  0xee   :  { %253 = vrot.lane.b32.xlu0 %v4792_v11, %s4657_s24 }
 0x15c   :  { %v176_v12 = vpop.permute.xlu0 %175 }
 0x15d   :  { %4202 = vmatpush3.xpose.msk.msra.mxu1 %vm177_vm2, %v176_v12 }
 0x15e   :  { %4206 = vmatprep.subr.mxu1 %v4655_v6 }
 0x160   :  { %4204 = vmatmul.mubr.msk.f32.vlgmr.msra.gmra.mxu1 %vm177_vm2, %v4788_v10  ;;  %v254_v13 = vpop.permute.xlu0 %253 }
 0x161   :  { %4207 = vmatpush3.xpose.msk.msra.mxu1 %vm177_vm2, %v254_v13  ;;  %4208 = vmatprep.mubr.msk.f32.mxu1 %vm4656_vm1, %v4655_v6 }
 0x162   :  { %4211 = vmatprep.subr.mxu1 %v4655_v6 }
 0x164   :  { %4209 = vmatmul.mubr.msk.f32.vlgmr.msra.gmra.mxu1 %vm177_vm2, %v4792_v11 }
 0x165   :  { %4213 = vmatprep.mubr.msk.f32.mxu1 %vm4656_vm1, %v4655_v6 }
 0x220   :  { %v248_v14 = vpop.f32.mrf.mxu1 }
 0x221   :  { %v329_v15 = vsel %vm177_vm2, %v248_v14, -inf }
 0x222   :  { %330 = vmax.xlane.f32.xlu1 %v329_v15  ;;  %v4205_v16 = vpop.f32.mrf.mxu1 }
 0x224   :  { %v325_v17 = vpop.f32.mrf.mxu1 }
 0x225   :  { %v332_v18 = vsel %vm177_vm2, %v325_v17, -inf }
 0x226   :  { %333 = vmax.xlane.f32.xlu1 %v332_v18  ;;  %v4210_v19 = vpop.f32.mrf.mxu1 }
 0x237   :  { %351 = vrot.lane.b32.xlu1 %v4788_v10, %s4658_s25 }
 0x23b   :  { %427 = vrot.lane.b32.xlu1 %v4792_v11, %s4658_s25 }
 0x23f   :  { %505 = vrot.lane.b32.xlu1 %v4788_v10, %s4659_s26 }
 0x243   :  { %583 = vrot.lane.b32.xlu1 %v4792_v11, %s4659_s26 }
 0x2ab   :  { %v331_v20 = vpop.xlane.xlu1 %330 }
 0x2ac   :  { %v335_v21 = vsub.f32 %v248_v14, %v331_v20 }
 0x2ae   :  { %v337_v22 = vmul.f32 1.442695, %v335_v21 }
 0x2af   :  { %v334_v23 = vpop.xlane.xlu1 %333 }
 0x2b0   :  { %4485 = vpow2.f32 %v337_v22  ;;  %v336_v24 = vsub.f32 %v325_v17, %v334_v23 }
 0x2b2   :  { %v339_v25 = vmul.f32 1.442695, %v336_v24 }
 0x2b3   :  { %v352_v26 = vpop.permute.xlu1 %351 }
 0x2b4   :  { %4487 = vpow2.f32 %v339_v25  ;;  %4212 = vmatpush3.msra.mxu1 %v352_v26 }
 0x2b5   :  { %4216 = vmatprep.subr.mxu1 %v4655_v6 }
 0x2b7   :  { %v428_v27 = vpop.permute.xlu1 %427 }
 0x2bb   :  { %v506_v28 = vpop.permute.xlu1 %505 }
 0x2bc   :  { %4222 = vmatpush3.xpose.msk.msra.mxu0 %vm177_vm2, %v506_v28 }
 0x2bd   :  { %v4486_v29 = vpop.eup %4485  ;;  %4231 = vmatprep.subr.mxu0 %v4655_v6 }
 0x2be   :  { %v341_v30 = vsel %vm177_vm2, %v4486_v29, 0.0 }
 0x2bf   :  { %342 = vadd.xlane.f32.xlu0 %v341_v30  ;;  %v584_v33 = vpop.permute.xlu1 %583 }
 0x2c1   :  { %v4488_v31 = vpop.eup %4487 }
 0x2c2   :  { %v344_v32 = vsel %vm177_vm2, %v4488_v31, 0.0 }
 0x2c3   :  { %345 = vadd.xlane.f32.xlu1 %v344_v32 }
 0x2d4   :  { %581 = vrot.lane.b32.xlu1 %v4792_v11, %s4660_s27 }
 0x2d5   :  { %503 = vrot.lane.b32.xlu0 %v4788_v10, %s4660_s27 }
 0x348   :  { %v343_v34 = vpop.xlane.xlu0 %342 }
 0x349   :  { %4489 = vrcp.f32 %v343_v34 }
 0x34c   :  { %v346_v35 = vpop.xlane.xlu1 %345  ;;  %v504_v36 = vpop.permute.xlu0 %503 }
 0x34d   :  { %4491 = vrcp.f32 %v346_v35  ;;  %4224 = vmatmul.mubr.msk.f32.vlgmr.msra.gmra.mxu0 %vm177_vm2, %v504_v36 }
 0x34e   :  { %4233 = vmatprep.mubr.msk.f32.mxu0 %vm4656_vm1, %v4655_v6 }
 0x350   :  { %v582_v41 = vpop.permute.xlu1 %581 }
 0x356   :  { %v4490_v37 = vpop.eup %4489 }
 0x357   :  { %v348_v38 = vmul.f32 %v4490_v37, %v4486_v29 }
 0x359   :  { %4214 = vmatmul.mubr.msk.f32.vlgmr.msra.gmra.mxu1 %vm177_vm2, %v348_v38 }
 0x35a   :  { %v4492_v39 = vpop.eup %4491  ;;  %4217 = vmatpush3.msra.mxu1 %v428_v27  ;;  %4218 = vmatprep.mubr.msk.f32.mxu1 %vm4656_vm1, %v4655_v6 }
 0x35b   :  { %4226 = vmatprep.subr.mxu1 %v4655_v6  ;;  %v350_v40 = vmul.f32 %v4492_v39, %v4488_v31 }
 0x35d   :  { %4219 = vmatmul.mubr.msk.f32.vlgmr.msra.gmra.mxu1 %vm177_vm2, %v350_v40 }
 0x35e   :  { %4227 = vmatpush3.xpose.msk.msra.mxu1 %vm177_vm2, %v584_v33  ;;  %4228 = vmatprep.mubr.msk.f32.mxu1 %vm4656_vm1, %v4655_v6 }
 0x35f   :  { %4236 = vmatprep.subr.mxu1 %v4655_v6 }
 0x361   :  { %4229 = vmatmul.mubr.msk.f32.vlgmr.msra.gmra.mxu1 %vm177_vm2, %v582_v41 }
 0x362   :  { %4238 = vmatprep.mubr.msk.f32.mxu1 %vm4656_vm1, %v4655_v6 }
 0x40d   :  { %v577_v42 = vpop.f32.mrf.mxu0 }
 0x40e   :  { %v659_v43 = vsel %vm177_vm2, %v577_v42, -inf }
 0x40f   :  { %660 = vmax.xlane.f32.xlu1 %v659_v43  ;;  %v4225_v44 = vpop.f32.mrf.mxu0 }
 0x419   :  { %v4843_v45 = vpop.f32.mrf.mxu1 }
 0x41b   :  { %v4215_v46 = vpop.f32.mrf.mxu1 }
 0x41d   :  { %v4845_v47 = vpop.f32.mrf.mxu1 }
 0x41f   :  { %v4220_v48 = vpop.f32.mrf.mxu1 }
 0x421   :  { %v655_v49 = vpop.f32.mrf.mxu1 }
 0x422   :  { %v662_v50 = vsel %vm177_vm2, %v655_v49, -inf }
 0x423   :  { %663 = vmax.xlane.f32.xlu0 %v662_v50  ;;  %v4230_v51 = vpop.f32.mrf.mxu1 }
 0x439   :  { %757 = vrot.lane.b32.xlu0 %v4792_v11, %s4661_s28 }
 0x43d   :  { %833 = vrot.lane.b32.xlu0 %v4788_v10, %s4662_s29 }
 0x498   :  { %v661_v52 = vpop.xlane.xlu1 %660 }
 0x499   :  { %v665_v53 = vsub.f32 %v577_v42, %v661_v52 }
 0x49b   :  { %v667_v54 = vmul.f32 1.442695, %v665_v53 }
 0x49d   :  { %4493 = vpow2.f32 %v667_v54 }
 0x4aa   :  { %v4494_v55 = vpop.eup %4493 }
 0x4ab   :  { %v671_v56 = vsel %vm177_vm2, %v4494_v55, 0.0 }
 0x4ac   :  { %672 = vadd.xlane.f32.xlu1 %v671_v56  ;;  %v664_v57 = vpop.xlane.xlu0 %663 }
 0x4ad   :  { %v666_v59 = vsub.f32 %v655_v49, %v664_v57 }
 0x4af   :  { %v669_v60 = vmul.f32 1.442695, %v666_v59 }
 0x4b0   :  { %v758_v58 = vpop.permute.xlu0 %757 }
 0x4b1   :  { %4237 = vmatpush3.msra.mxu1 %v758_v58  ;;  %4495 = vpow2.f32 %v669_v60 }
 0x4b2   :  { %4246 = vmatprep.subr.mxu1 %v4655_v6 }
 0x4b4   :  { %v834_v7 = vpop.permute.xlu0 %833 }
 0x4bd   :  { %681 = vrot.lane.b32.xlu1 %v4788_v10, %s4661_s28 }
 0x4be   :  { %v4496_v61 = vpop.eup %4495 }
 0x4bf   :  { %v674_v62 = vsel %vm177_vm2, %v4496_v61, 0.0 }
 0x4c1   :  { %835 = vrot.lane.b32.xlu1 %v4788_v10, %s4663_s0 }
 0x4c5   :  { %913 = vrot.lane.b32.xlu1 %v4792_v11, %s4663_s0 }
 0x4e9   :  { %675 = vadd.xlane.f32.xlu1 %v674_v62 }
 0x4fa   :  { %911 = vrot.lane.b32.xlu1 %v4792_v11, %s4662_s29 }
 0x535   :  { %v673_v63 = vpop.xlane.xlu1 %672 }
 0x536   :  { %4497 = vrcp.f32 %v673_v63 }
 0x539   :  { %v682_v0 = vpop.permute.xlu1 %681 }
 0x53a   :  { %4232 = vmatpush3.msra.mxu0 %v682_v0 }
 0x53b   :  { %4241 = vmatprep.subr.mxu0 %v4655_v6 }
 0x53d   :  { %v836_v4 = vpop.permute.xlu1 %835 }
 0x541   :  { %v914_v8 = vpop.permute.xlu1 %913 }
 0x543   :  { %v4498_v1 = vpop.eup %4497 }
 0x544   :  { %v678_v3 = vmul.f32 %v4498_v1, %v4494_v55 }
 0x546   :  { %4234 = vmatmul.mubr.msk.f32.vlgmr.msra.gmra.mxu0 %vm177_vm2, %v678_v3 }
 0x547   :  { %4242 = vmatpush3.xpose.msk.msra.mxu0 %vm177_vm2, %v836_v4  ;;  %4243 = vmatprep.mubr.msk.f32.mxu0 %vm4656_vm1, %v4655_v6 }
 0x548   :  { %4251 = vmatprep.subr.mxu0 %v4655_v6 }
 0x54a   :  { %4244 = vmatmul.mubr.msk.f32.vlgmr.msra.gmra.mxu0 %vm177_vm2, %v834_v7 }
 0x54b   :  { %4253 = vmatprep.mubr.msk.f32.mxu0 %vm4656_vm1, %v4655_v6 }
 0x572   :  { %v676_v9 = vpop.xlane.xlu1 %675 }
 0x573   :  { %4499 = vrcp.f32 %v676_v9 }
 0x576   :  { %v912_v14 = vpop.permute.xlu1 %911 }
 0x580   :  { %v4500_v12 = vpop.eup %4499 }
 0x581   :  { %v680_v13 = vmul.f32 %v4500_v12, %v4496_v61 }
 0x583   :  { %4239 = vmatmul.mubr.msk.f32.vlgmr.msra.gmra.mxu1 %vm177_vm2, %v680_v13 }
 0x584   :  { %4247 = vmatpush3.xpose.msk.msra.mxu1 %vm177_vm2, %v914_v8  ;;  %4248 = vmatprep.mubr.msk.f32.mxu1 %vm4656_vm1, %v4655_v6 }
 0x585   :  { %4256 = vmatprep.subr.mxu1 %v4655_v6 }
 0x587   :  { %4249 = vmatmul.mubr.msk.f32.vlgmr.msra.gmra.mxu1 %vm177_vm2, %v912_v14 }
 0x588   :  { %4258 = vmatprep.mubr.msk.f32.mxu1 %vm4656_vm1, %v4655_v6 }
 0x606   :  { %v4880_v15 = vpop.f32.mrf.mxu0 }
 0x608   :  { %v4235_v16 = vpop.f32.mrf.mxu0 }
 0x60a   :  { %v907_v17 = vpop.f32.mrf.mxu0 }
 0x60b   :  { %v989_v18 = vsel %vm177_vm2, %v907_v17, -inf }
 0x60c   :  { %990 = vmax.xlane.f32.xlu0 %v989_v18  ;;  %v4245_v19 = vpop.f32.mrf.mxu0  ;;  %v1526_v18 = vld [vmem:[%s5337_s3 + $0x8] sm:$0xff] }
 0x60d   :  { %v1525_v19 = vld [vmem:[%s5337_s3] sm:$0xff] }
 0x643   :  { %v4883_v20 = vpop.f32.mrf.mxu1 }
 0x645   :  { %v4240_v21 = vpop.f32.mrf.mxu1 }
 0x647   :  { %v985_v22 = vpop.f32.mrf.mxu1 }
 0x648   :  { %v992_v23 = vsel %vm177_vm2, %v985_v22, -inf }
 0x649   :  { %993 = vmax.xlane.f32.xlu1 %v992_v23  ;;  %v4250_v24 = vpop.f32.mrf.mxu1 }
 0x65a   :  { %1011 = vrot.lane.b32.xlu1 %v4788_v10, %s4664_s30 }
 0x65e   :  { %1165 = vrot.lane.b32.xlu1 %v4788_v10, %s4665_s16 }
 0x662   :  { %1243 = vrot.lane.b32.xlu1 %v4792_v11, %s4665_s16 }
 0x666   :  { %1241 = vrot.lane.b32.xlu1 %v4792_v11, %s5356_s17 }
 0x695   :  { %v991_v25 = vpop.xlane.xlu0 %990 }
 0x696   :  { %v995_v26 = vsub.f32 %v907_v17, %v991_v25  ;;  %v1527_v17 = vld [vmem:[%s5337_s3 + $0x10] sm:$0xff] }
 0x698   :  { %v997_v27 = vmul.f32 1.442695, %v995_v26 }
 0x69a   :  { %4501 = vpow2.f32 %v997_v27 }
 0x6a7   :  { %v4502_v28 = vpop.eup %4501 }
 0x6a8   :  { %v1001_v29 = vsel %vm177_vm2, %v4502_v28, 0.0 }
 0x6a9   :  { %1002 = vadd.xlane.f32.xlu0 %v1001_v29 }
 0x6bf   :  { %1087 = vrot.lane.b32.xlu0 %v4792_v11, %s4664_s30 }
 0x6d2   :  { %v994_v30 = vpop.xlane.xlu1 %993 }
 0x6d3   :  { %v996_v31 = vsub.f32 %v985_v22, %v994_v30 }
 0x6d5   :  { %v999_v32 = vmul.f32 1.442695, %v996_v31 }
 0x6d6   :  { %v1012_v33 = vpop.permute.xlu1 %1011 }
 0x6d7   :  { %4503 = vpow2.f32 %v999_v32  ;;  %4252 = vmatpush3.msra.mxu0 %v1012_v33 }
 0x6d8   :  { %4261 = vmatprep.subr.mxu0 %v4655_v6 }
 0x6da   :  { %v1166_v40 = vpop.permute.xlu1 %1165 }
 0x6de   :  { %v1244_v44 = vpop.permute.xlu1 %1243 }
 0x6e2   :  { %v1242_v48 = vpop.permute.xlu1 %1241 }
 0x6e4   :  { %v4504_v34 = vpop.eup %4503 }
 0x6e5   :  { %v1004_v35 = vsel %vm177_vm2, %v4504_v34, 0.0 }
 0x6e6   :  { %1005 = vadd.xlane.f32.xlu0 %v1004_v35 }
 0x6fc   :  { %1163 = vrot.lane.b32.xlu0 %v4788_v10, %s5356_s17  ;;  %s5364_s17 = smov 24  }
 0x732   :  { %v1003_v36 = vpop.xlane.xlu0 %1002 }
 0x733   :  { %4505 = vrcp.f32 %v1003_v36 }
 0x736   :  { %v1088_v37 = vpop.permute.xlu0 %1087 }
 0x737   :  { %4257 = vmatpush3.msra.mxu1 %v1088_v37 }
 0x738   :  { %4266 = vmatprep.subr.mxu1 %v4655_v6 }
 0x740   :  { %v4506_v38 = vpop.eup %4505 }
 0x741   :  { %v1008_v39 = vmul.f32 %v4506_v38, %v4502_v28 }
 0x743   :  { %4254 = vmatmul.mubr.msk.f32.vlgmr.msra.gmra.mxu0 %vm177_vm2, %v1008_v39 }
 0x744   :  { %4262 = vmatpush3.xpose.msk.msra.mxu0 %vm177_vm2, %v1166_v40  ;;  %4263 = vmatprep.mubr.msk.f32.mxu0 %vm4656_vm1, %v4655_v6 }
 0x745   :  { %4271 = vmatprep.subr.mxu0 %v4655_v6 }
 0x76f   :  { %v1006_v41 = vpop.xlane.xlu0 %1005 }
 0x770   :  { %4507 = vrcp.f32 %v1006_v41 }
 0x773   :  { %v1164_v42 = vpop.permute.xlu0 %1163 }
 0x774   :  { %4264 = vmatmul.mubr.msk.f32.vlgmr.msra.gmra.mxu0 %vm177_vm2, %v1164_v42 }
 0x775   :  { %4273 = vmatprep.mubr.msk.f32.mxu0 %vm4656_vm1, %v4655_v6 }
 0x77d   :  { %v4508_v43 = vpop.eup %4507 }
 0x77e   :  { %v1010_v46 = vmul.f32 %v4508_v43, %v4504_v34 }
 0x780   :  { %4259 = vmatmul.mubr.msk.f32.vlgmr.msra.gmra.mxu1 %vm177_vm2, %v1010_v46 }
 0x781   :  { %4267 = vmatpush3.xpose.msk.msra.mxu1 %vm177_vm2, %v1244_v44  ;;  %4268 = vmatprep.mubr.msk.f32.mxu1 %vm4656_vm1, %v4655_v6 }
 0x782   :  { %4276 = vmatprep.subr.mxu1 %v4655_v6 }
 0x784   :  { %4269 = vmatmul.mubr.msk.f32.vlgmr.msra.gmra.mxu1 %vm177_vm2, %v1242_v48 }
 0x785   :  { %4278 = vmatprep.mubr.msk.f32.mxu1 %vm4656_vm1, %v4655_v6 }
 0x803   :  { %v1083_v49 = vpop.f32.mrf.mxu0 }
 0x805   :  { %v4255_v50 = vpop.f32.mrf.mxu0 }
 0x834   :  { %v1237_v51 = vpop.f32.mrf.mxu0 }
 0x835   :  { %v1319_v52 = vsel %vm177_vm2, %v1237_v51, -inf }
 0x836   :  { %1320 = vmax.xlane.f32.xlu0 %v1319_v52  ;;  %v4265_v53 = vpop.f32.mrf.mxu0 }
 0x840   :  { %v1159_v54 = vpop.f32.mrf.mxu1 }
 0x842   :  { %v4260_v55 = vpop.f32.mrf.mxu1 }
 0x843   :  { %v1665_v55 = vld [vmem:[%s5341_s7 + $0x8] sm:$0xff] }
 0x844   :  { %v1315_v56 = vpop.f32.mrf.mxu1 }
 0x845   :  { %v1322_v57 = vsel %vm177_vm2, %v1315_v56, -inf }
 0x846   :  { %1323 = vmax.xlane.f32.xlu1 %v1322_v57  ;;  %v4270_v58 = vpop.f32.mrf.mxu1 }
 0x857   :  { %1341 = vrot.lane.b32.xlu1 %v4788_v10, %s5354_s18 }
 0x85b   :  { %1495 = vrot.lane.b32.xlu1 %v4880_v15, %s5352_s22 }
 0x85f   :  { %1497 = vrot.lane.b32.xlu1 %v4883_v20, %s5352_s22 }
 0x863   :  { %1505 = vrot.lane.b32.xlu1 %v1159_v54, %s5350_s19  ;;  %v1666_v54 = vld [vmem:[%s5341_s7 + $0x10] sm:$0xff] }
 0x8bf   :  { %v1321_v59 = vpop.xlane.xlu0 %1320 }
 0x8c0   :  { %v1325_v60 = vsub.f32 %v1237_v51, %v1321_v59 }
 0x8c2   :  { %v1327_v61 = vmul.f32 1.442695, %v1325_v60 }
 0x8c4   :  { %4509 = vpow2.f32 %v1327_v61 }
 0x8cf   :  { %v1324_v62 = vpop.xlane.xlu1 %1323 }
 0x8d0   :  { %v1326_v63 = vsub.f32 %v1315_v56, %v1324_v62  ;;  %v1664_v56 = vld [vmem:[%s5341_s7] sm:$0xff] }
 0x8d1   :  { %v4510_v0 = vpop.eup %4509 }
 0x8d2   :  { %v1329_v1 = vmul.f32 1.442695, %v1326_v63  ;;  %v1331_v3 = vsel %vm177_vm2, %v4510_v0, 0.0 }
 0x8d3   :  { %v1342_v10 = vpop.permute.xlu1 %1341  ;;  %1332 = vadd.xlane.f32.xlu0 %v1331_v3  ;;  %v3986_v3 = vld [vmem:[%s5340_s6] ss:$0 sm:$0xff] }
 0x8d4   :  { %4511 = vpow2.f32 %v1329_v1  ;;  %4272 = vmatpush3.msra.mxu0 %v1342_v10 }
 0x8d7   :  { %v1496_v24 = vpop.permute.xlu1 %1495 }
 0x8d8   :  { %v1517_v26 = vsel %vm177_vm2, %v4843_v45, %v1496_v24  ;;  %v3982_v45 = vld [vmem:[%s5338_s4] ss:$0 sm:$0xff] }
 0x8db   :  { %v1498_v30 = vpop.permute.xlu1 %1497 }
 0x8dc   :  { %v1518_v32 = vsel %vm177_vm2, %v4845_v47, %v1498_v30 }
 0x8df   :  { %v1506_v31 = vpop.permute.xlu1 %1505 }
 0x8e0   :  { %v1521_v33 = vsel %vm1519_vm4, %v1518_v32, %v1506_v31 }
 0x8e1   :  { %v4512_v4 = vpop.eup %4511 }
 0x8e2   :  { %v1334_v7 = vsel %vm177_vm2, %v4512_v4, 0.0 }
 0x8e3   :  { %1335 = vadd.xlane.f32.xlu0 %v1334_v7 }
 0x8f9   :  { %1417 = vrot.lane.b32.xlu0 %v4792_v11, %s5354_s18  ;;  %v1528_v11 = vld [vmem:[%s5337_s3 + $0x18] sm:$0xff] }
 0x8fa   :  { %4281 = vmatprep.subr.mxu0 %v1528_v11 }
 0x8fd   :  { %1503 = vrot.lane.b32.xlu0 %v1083_v49, %s5350_s19 }
 0x95c   :  { %v1333_v8 = vpop.xlane.xlu0 %1332 }
 0x95d   :  { %4513 = vrcp.f32 %v1333_v8 }
 0x96a   :  { %v4514_v9 = vpop.eup %4513 }
 0x96b   :  { %v1338_v12 = vmul.f32 %v4514_v9, %v4510_v0  ;;  %v3985_v0 = vld [vmem:[%s5339_s5] ss:$0 sm:$0xff] }
 0x96c   :  { %v1336_v13 = vpop.xlane.xlu0 %1335 }
 0x96d   :  { %4515 = vrcp.f32 %v1336_v13  ;;  %4274 = vmatmul.mubr.msk.f32.vlgmr.msra.gmra.mxu0 %vm177_vm2, %v1338_v12  ;;  %v1774_v13 = vld [vmem:[%s5343_s9 + $0x38] sm:$0xff] }
 0x96e   :  { %4282 = vmatpush3.msra.mxu0 %v1528_v11  ;;  %v1770_v11 = vld [vmem:[%s5343_s9 + $0x18] sm:$0xff] }
 0x96f   :  { %4283 = vmatprep.subr.mxu0 %v1527_v17 }
 0x970   :  { %v1418_v14 = vpop.permute.xlu0 %1417  ;;  %4284 = vmatpush3.msra.mxu0 %v1527_v17  ;;  %v1769_v17 = vld [vmem:[%s5343_s9 + $0x10] sm:$0xff] }
 0x971   :  { %4277 = vmatpush3.msra.mxu1 %v1418_v14  ;;  %4285 = vmatprep.subr.mxu0 %v1526_v18  ;;  %v1773_v14 = vld [vmem:[%s5343_s9 + $0x30] sm:$0xff] }
 0x972   :  { %4286 = vmatpush3.msra.mxu0 %v1526_v18  ;;  %v1768_v18 = vld [vmem:[%s5343_s9 + $0x8] sm:$0xff] }
 0x973   :  { %4287 = vmatprep.subr.mxu0 %v1525_v19 }
 0x974   :  { %4288 = vmatpush3.msra.mxu0 %v1525_v19  ;;  %v1504_v25 = vpop.permute.xlu0 %1503  ;;  %v1767_v19 = vld [vmem:[%s5343_s9] sm:$0xff] }
 0x975   :  { %v1520_v27 = vsel %vm1519_vm4, %v1517_v26, %v1504_v25  ;;  %4303 = vmatprep.subr.mxu0 %v1774_v13 }
 0x97a   :  { %v4516_v15 = vpop.eup %4515 }
 0x97b   :  { %v1340_v16 = vmul.f32 %v4516_v15, %v4512_v4  ;;  %v1772_v15 = vld [vmem:[%s5343_s9 + $0x28] sm:$0xff] }
 0x97d   :  { %4279 = vmatmul.mubr.msk.f32.vlgmr.msra.gmra.mxu1 %vm177_vm2, %v1340_v16  ;;  %v1771_v16 = vld [vmem:[%s5343_s9 + $0x20] sm:$0xff] }
 0xa2d   :  { %v1413_v20 = vpop.f32.mrf.mxu0 }
 0xa2e   :  { %1511 = vrot.lane.b32.xlu0 %v1413_v20, %s5358_s13  ;;  %v3987_v20 = vld [vmem:[%s5342_s8] ss:$0 sm:$0xff] }
 0xa2f   :  { %v4275_v21 = vpop.f32.mrf.mxu0 }
 0xa3d   :  { %v1489_v22 = vpop.f32.mrf.mxu1 }
 0xa3e   :  { %1513 = vrot.lane.b32.xlu1 %v1489_v22, %s5358_s13 }
 0xa3f   :  { %v4280_v23 = vpop.f32.mrf.mxu1 }
 0xaa0   :  { %v1512_v28 = vpop.permute.xlu0 %1511 }
 0xaa1   :  { %v1523_v29 = vsel %vm1522_vm3, %v1520_v27, %v1512_v28 }
 0xaa2   :  { %4289 = vmatprep.mubr.msk.f32.mxu0 %vm92_vm0, %v1523_v29 }
 0xab0   :  { %v1514_v34 = vpop.permute.xlu1 %1513 }
 0xab1   :  { %v1524_v35 = vsel %vm1522_vm3, %v1521_v33, %v1514_v34 }
 0xab2   :  { %4290 = vmatmul.mubr.msk.f32.vlgmr.msra.gmra.mxu0 %vm92_vm0, %v1524_v35  ;;  %v3990_v35 = vld [vmem:[%s5344_s10] ss:$0 sm:$0xff] }
 0xab3   :  { %4304 = vmatpush3.msra.mxu0 %v1774_v13 }
 0xab4   :  { %4305 = vmatprep.subr.mxu0 %v1773_v14 }
 0xab5   :  { %4306 = vmatpush3.msra.mxu0 %v1773_v14 }
 0xab6   :  { %4307 = vmatprep.subr.mxu0 %v1772_v15 }
 0xab7   :  { %4308 = vmatpush3.msra.mxu0 %v1772_v15 }
 0xab8   :  { %4309 = vmatprep.subr.mxu0 %v1771_v16 }
 0xab9   :  { %4310 = vmatpush3.msra.mxu0 %v1771_v16 }
 0xaba   :  { %4311 = vmatprep.subr.mxu0 %v1770_v11 }
 0xabb   :  { %4312 = vmatpush3.msra.mxu0 %v1770_v11 }
 0xabc   :  { %4313 = vmatprep.subr.mxu0 %v1769_v17 }
 0xabd   :  { %4314 = vmatpush3.msra.mxu0 %v1769_v17 }
 0xabe   :  { %4315 = vmatprep.subr.mxu0 %v1768_v18 }
 0xabf   :  { %4316 = vmatpush3.msra.mxu0 %v1768_v18 }
 0xac0   :  { %4317 = vmatprep.subr.mxu0 %v1767_v19 }
 0xac1   :  { %4318 = vmatpush3.msra.mxu0 %v1767_v19 }
 0xac2   :  { %4343 = vmatprep.subr.mxu0 %v4655_v6 }
 0xb72   :  { %v4291_v36 = vpop.f32.mrf.mxu0 }
 0xb73   :  { %v1614_v37 = vadd.f32 %v4291_v36, %v3982_v45 }
 0xb74   :  { %v1608_v38 = vpop.f32.mrf.mxu0 }
 0xb75   :  { %v1609_v39 = vadd.f32 %v3982_v45, %v1608_v38  ;;  %v1618_v40 = vadd.f32 %v1614_v37, %v4775_v5 }
 0xb77   :  { %v1624_v41 = vsel %vm92_vm0, %v1618_v40, 0.0  ;;  %v1617_v47 = vadd.f32 %v1609_v39, %v4765_v2  ;;  %v1667_v2 = vld [vmem:[%s5341_s7 + $0x18] sm:$0xff] }
 0xb78   :  { %1625 = vadd.xlane.f32.xlu1 %v1624_v41  ;;  %4292 = vmatprep.subr.mxu1 %v1667_v2 }
 0xb79   :  { %v1621_v42 = vsel %vm92_vm0, %v1617_v47, 0.0  ;;  %4293 = vmatpush3.msra.mxu1 %v1667_v2  ;;  %v3997_v2 = vld [vmem:[%s5335_s1 + $0x30] sm:$0xff] }
 0xb7a   :  { %1622 = vadd.xlane.f32.xlu0 %v1621_v42  ;;  %4294 = vmatprep.subr.mxu1 %v1666_v54 }
 0xb7b   :  { %4295 = vmatpush3.msra.mxu1 %v1666_v54  ;;  %v3996_v54 = vld [vmem:[%s5335_s1 + $0x28] sm:$0xff] }
 0xb7c   :  { %4296 = vmatprep.subr.mxu1 %v1665_v55 }
 0xb7d   :  { %4297 = vmatpush3.msra.mxu1 %v1665_v55  ;;  %v3995_v55 = vld [vmem:[%s5335_s1 + $0x20] sm:$0xff] }
 0xb7e   :  { %4298 = vmatprep.subr.mxu1 %v1664_v56 }
 0xb7f   :  { %4299 = vmatpush3.msra.mxu1 %v1664_v56 }
 0xc01   :  { %v1626_v43 = vpop.xlane.xlu1 %1625 }
 0xc02   :  { %v1629_v44 = vmul.f32 0.03125, %v1626_v43 }
 0xc03   :  { %v1623_v46 = vpop.xlane.xlu0 %1622 }
 0xc04   :  { %v1628_v48 = vmul.f32 0.03125, %v1623_v46  ;;  %v1631_v49 = vsub.f32 %v1618_v40, %v1629_v44 }
 0xc06   :  { %v1630_v50 = vsub.f32 %v1617_v47, %v1628_v48  ;;  %v1633_v53 = vmul.f32 %v1631_v49, %v1631_v49 }
 0xc08   :  { %v1632_v51 = vmul.f32 %v1630_v50, %v1630_v50  ;;  %v1637_v5 = vsel %vm92_vm0, %v1633_v53, 0.0 }
 0xc0a   :  { %v1634_v52 = vsel %vm92_vm0, %v1632_v51, 0.0 }
 0xc0b   :  { %1635 = vadd.xlane.f32.xlu0 %v1634_v52 }
 0xc0f   :  { %1638 = vadd.xlane.f32.xlu0 %v1637_v5  ;;  %v3998_v5 = vld [vmem:[%s5335_s1 + $0x38] sm:$0xff] }
 0xc10   :  { %4322 = vmatprep.subr.mxu1 %v3998_v5 }
 0xc94   :  { %v1636_v57 = vpop.xlane.xlu0 %1635 }
 0xc95   :  { %v1640_v58 = vmul.f32 0.03125, %v1636_v57 }
 0xc97   :  { %v1642_v59 = vadd.f32 1e-05, %v1640_v58 }
 0xc98   :  { %v1639_v60 = vpop.xlane.xlu0 %1638 }
 0xc99   :  { %4517 = vrsqrt.f32 %v1642_v59  ;;  %v1641_v61 = vmul.f32 0.03125, %v1639_v60 }
 0xc9b   :  { %v1643_v62 = vadd.f32 1e-05, %v1641_v61 }
 0xc9d   :  { %4519 = vrsqrt.f32 %v1643_v62 }
 0xca6   :  { %v4518_v63 = vpop.eup %4517 }
 0xca7   :  { %v1646_v1 = vmul.f32 %v4518_v63, %v1630_v50  ;;  %v3993_v63 = vld [vmem:[%s5345_s11] ss:$0 sm:$0xff] }
 0xca9   :  { %v1654_v10 = vmul.f32 %v3985_v0, %v1646_v1 }
 0xcaa   :  { %v4520_v4 = vpop.eup %4519 }
 0xcab   :  { %v1647_v7 = vmul.f32 %v4520_v4, %v1631_v49  ;;  %v1662_v8 = vadd.f32 %v3986_v3, %v1654_v10  ;;  %v3994_v4 = vld [vmem:[%s5346_s12] ss:$0 sm:$0xff] }
 0xcad   :  { %v1655_v9 = vmul.f32 %v3985_v0, %v1647_v7  ;;  %4300 = vmatprep.mubr.msk.f32.mxu1 %vm92_vm0, %v1662_v8 }
 0xcaf   :  { %v1663_v12 = vadd.f32 %v3986_v3, %v1655_v9 }
 0xcb1   :  { %4301 = vmatmul.mubr.msk.f32.vlgmr.msra.gmra.mxu1 %vm92_vm0, %v1663_v12 }
 0xcb2   :  { %4323 = vmatpush3.msra.mxu1 %v3998_v5 }
 0xcb3   :  { %4324 = vmatprep.subr.mxu1 %v3997_v2 }
 0xcb4   :  { %4325 = vmatpush3.msra.mxu1 %v3997_v2 }
 0xcb5   :  { %4326 = vmatprep.subr.mxu1 %v3996_v54 }
 0xcb6   :  { %4327 = vmatpush3.msra.mxu1 %v3996_v54 }
 0xcb7   :  { %4328 = vmatprep.subr.mxu1 %v3995_v55 }
 0xcb8   :  { %4329 = vmatpush3.msra.mxu1 %v3995_v55 }
 0xcb9   :  { %4333 = vmatprep.subr.mxu1 %v4655_v6 }
 0xd71   :  { %v4302_v21 = vpop.f32.mrf.mxu1 }
 0xd72   :  { %v1753_v22 = vadd.f32 %v4302_v21, %v3987_v20 }
 0xd73   :  { %v1747_v23 = vpop.f32.mrf.mxu1 }
 0xd74   :  { %v1760_v24 = vmul.f32 0.70710677, %v1753_v22  ;;  %v1748_v25 = vadd.f32 %v3987_v20, %v1747_v23  ;;  %v1757_v32 = vmul.f32 0.5, %v1753_v22 }
 0xd76   :  { %4521 = verf.f32 %v1760_v24  ;;  %v1759_v26 = vmul.f32 0.70710677, %v1748_v25  ;;  %v1756_v30 = vmul.f32 0.5, %v1748_v25 }
 0xd78   :  { %4523 = verf.f32 %v1759_v26 }
 0xd83   :  { %v4522_v27 = vpop.eup %4521 }
 0xd84   :  { %v1764_v29 = vadd.f32 1.0, %v4522_v27 }
 0xd85   :  { %v4524_v28 = vpop.eup %4523 }
 0xd86   :  { %v1763_v31 = vadd.f32 1.0, %v4524_v28  ;;  %v1766_v34 = vmul.f32 %v1764_v29, %v1757_v32 }
 0xd88   :  { %v1765_v33 = vmul.f32 %v1763_v31, %v1756_v30 }
 0xd8a   :  { %4319 = vmatprep.mubr.msk.f32.mxu0 %vm1782_vm5, %v1765_v33 }
 0xd8b   :  { %4320 = vmatmul.mubr.msk.f32.vlgmr.msra.gmra.mxu0 %vm1782_vm5, %v1766_v34 }
 0xd8c   :  { %4345 = vmatprep.mubr.msk.f32.mxu0 %vm4656_vm1, %v4655_v6 }
 0xe4b   :  { %v4321_v45 = vpop.f32.mrf.mxu0 }
 0xe4c   :  { %v1861_v36 = vadd.f32 %v4321_v45, %v3990_v35 }
 0xe4d   :  { %v1855_v37 = vpop.f32.mrf.mxu0 }
 0xe4e   :  { %v1856_v38 = vadd.f32 %v3990_v35, %v1855_v37  ;;  %v1865_v39 = vadd.f32 %v1861_v36, %v1663_v12  ;;  %v4000_v12 = vld [vmem:[%s5336_s2 + $0x1] ss:$0 sm:$0xff]  ;;  %s5360_s2 = smov 104  }
 0xe50   :  { %v1871_v40 = vsel %vm92_vm0, %v1865_v39, 0.0  ;;  %v1864_v41 = vadd.f32 %v1856_v38, %v1662_v8 }
 0xe51   :  { %1872 = vadd.xlane.f32.xlu0 %v1871_v40 }
 0xe52   :  { %v1868_v47 = vsel %vm92_vm0, %v1864_v41, 0.0 }
 0xe53   :  { %1869 = vadd.xlane.f32.xlu1 %v1868_v47 }
 0xeda   :  { %v1873_v42 = vpop.xlane.xlu0 %1872 }
 0xedb   :  { %v1875_v43 = vmul.f32 0.03125, %v1873_v42 }
 0xedc   :  { %v1870_v44 = vpop.xlane.xlu1 %1869 }
 0xedd   :  { %v1877_v46 = vsub.f32 %v1865_v39, %v1875_v43  ;;  %v1874_v48 = vmul.f32 0.03125, %v1870_v44 }
 0xedf   :  { %v1876_v49 = vsub.f32 %v1864_v41, %v1874_v48  ;;  %v1879_v50 = vmul.f32 %v1877_v46, %v1877_v46 }
 0xee1   :  { %v1883_v51 = vsel %vm92_vm0, %v1879_v50, 0.0  ;;  %v1878_v52 = vmul.f32 %v1876_v49, %v1876_v49 }
 0xee2   :  { %1884 = vadd.xlane.f32.xlu0 %v1883_v51 }
 0xee3   :  { %v1880_v53 = vsel %vm92_vm0, %v1878_v52, 0.0 }
 0xee4   :  { %1881 = vadd.xlane.f32.xlu1 %v1880_v53 }
 0xf6b   :  { %v1885_v56 = vpop.xlane.xlu0 %1884 }
 0xf6c   :  { %v1887_v57 = vmul.f32 0.03125, %v1885_v56 }
 0xf6d   :  { %v1882_v58 = vpop.xlane.xlu1 %1881 }
 0xf6e   :  { %v1889_v59 = vadd.f32 1e-05, %v1887_v57  ;;  %v1886_v60 = vmul.f32 0.03125, %v1882_v58 }
 0xf70   :  { %4525 = vrsqrt.f32 %v1889_v59  ;;  %v1888_v61 = vadd.f32 1e-05, %v1886_v60 }
 0xf72   :  { %4527 = vrsqrt.f32 %v1888_v61 }
 0xf7d   :  { %v4526_v62 = vpop.eup %4525 }
 0xf7e   :  { %v1893_v0 = vmul.f32 %v4526_v62, %v1877_v46 }
 0xf7f   :  { %v4528_v1 = vpop.eup %4527 }
 0xf80   :  { %v1892_v3 = vmul.f32 %v4528_v1, %v1876_v49  ;;  %v1901_v10 = vmul.f32 %v3993_v63, %v1893_v0 }
 0xf82   :  { %v1900_v7 = vmul.f32 %v3993_v63, %v1892_v3  ;;  %v5047_v9 = vadd.f32 %v3994_v4, %v1901_v10 }
 0xf84   :  { %v5045_v8 = vadd.f32 %v3994_v4, %v1900_v7 }
 0xf86   :  { %4330 = vmatprep.mubr.msk.f32.mxu1 %vm92_vm0, %v5045_v8 }
 0xf87   :  { %4331 = vmatmul.mubr.msk.f32.vlgmr.msra.gmra.mxu1 %vm92_vm0, %v5047_v9 }
 0xf88   :  { %4335 = vmatprep.mubr.msk.f32.mxu1 %vm4656_vm1, %v4655_v6 }
0x1047   :  { %v4332_v13 = vpop.f32.mrf.mxu1 }
0x1048   :  { %v5058_v14 = vadd.f32 %v4332_v13, %v4000_v12 }
0x1049   :  { %v1995_v15 = vpop.f32.mrf.mxu1 }
0x104a   :  { %v5060_v16 = vadd.f32 %v4000_v12, %v1995_v15  ;;  %2082 = vrot.lane.b32.xlu0 %v5058_v14, %s4657_s24 }
0x104c   :  { %2005 = vrot.lane.b32.xlu1 %v5060_v16, %s4657_s24  ;;  %s5361_s24 = smov 40  }
0x10bc   :  { %v2083_v17 = vpop.permute.xlu0 %2082 }
0x10be   :  { %v2006_v11 = vpop.permute.xlu1 %2005 }
0x10bf   :  { %4334 = vmatpush3.xpose.msk.msra.mxu1 %vm177_vm2, %v2006_v11 }
0x10c0   :  { %4338 = vmatprep.subr.mxu1 %v4655_v6 }
0x10c2   :  { %4336 = vmatmul.mubr.msk.f32.vlgmr.msra.gmra.mxu1 %vm177_vm2, %v5060_v16 }
0x10c3   :  { %4339 = vmatpush3.xpose.msk.msra.mxu1 %vm177_vm2, %v2083_v17  ;;  %4340 = vmatprep.mubr.msk.f32.mxu1 %vm4656_vm1, %v4655_v6 }
0x10c4   :  { %4348 = vmatprep.subr.mxu1 %v4655_v6 }
0x10c6   :  { %4341 = vmatmul.mubr.msk.f32.vlgmr.msra.gmra.mxu1 %vm177_vm2, %v5058_v14 }
0x10c7   :  { %4350 = vmatprep.mubr.msk.f32.mxu1 %vm4656_vm1, %v4655_v6 }
0x1182   :  { %v2077_v18 = vpop.f32.mrf.mxu1 }
0x1183   :  { %v2158_v19 = vsel %vm177_vm2, %v2077_v18, -inf }
0x1184   :  { %2159 = vmax.xlane.f32.xlu1 %v2158_v19  ;;  %v4337_v20 = vpop.f32.mrf.mxu1 }
0x1186   :  { %v2154_v21 = vpop.f32.mrf.mxu1 }
0x1187   :  { %v2161_v22 = vsel %vm177_vm2, %v2154_v21, -inf }
0x1188   :  { %2162 = vmax.xlane.f32.xlu0 %v2161_v22  ;;  %v4342_v23 = vpop.f32.mrf.mxu1 }
0x1195   :  { %2180 = vrot.lane.b32.xlu1 %v5060_v16, %s4658_s25 }
0x1199   :  { %2334 = vrot.lane.b32.xlu1 %v5060_v16, %s4659_s26 }
0x119d   :  { %2412 = vrot.lane.b32.xlu1 %v5058_v14, %s4659_s26  ;;  %s5363_s26 = smov 16  }
0x119e   :  { %2256 = vrot.lane.b32.xlu0 %v5058_v14, %s4658_s25  ;;  %s5362_s25 = smov 8  }
0x120d   :  { %v2160_v24 = vpop.xlane.xlu1 %2159 }
0x120e   :  { %v2164_v25 = vsub.f32 %v2077_v18, %v2160_v24 }
0x1210   :  { %v2166_v26 = vmul.f32 1.442695, %v2164_v25 }
0x1211   :  { %v2181_v27 = vpop.permute.xlu1 %2180  ;;  %v2163_v28 = vpop.xlane.xlu0 %2162 }
0x1212   :  { %4529 = vpow2.f32 %v2166_v26  ;;  %v2165_v29 = vsub.f32 %v2154_v21, %v2163_v28  ;;  %4344 = vmatpush3.msra.mxu0 %v2181_v27 }
0x1213   :  { %4353 = vmatprep.subr.mxu0 %v4655_v6 }
0x1214   :  { %v2168_v30 = vmul.f32 1.442695, %v2165_v29 }
0x1215   :  { %v2257_v31 = vpop.permute.xlu0 %2256  ;;  %v2335_v45 = vpop.permute.xlu1 %2334 }
0x1216   :  { %4531 = vpow2.f32 %v2168_v30  ;;  %4349 = vmatpush3.msra.mxu1 %v2257_v31 }
0x1217   :  { %4358 = vmatprep.subr.mxu1 %v4655_v6 }
0x1219   :  { %v2413_v36 = vpop.permute.xlu1 %2412 }
0x121f   :  { %v4530_v32 = vpop.eup %4529 }
0x1220   :  { %v2170_v33 = vsel %vm177_vm2, %v4530_v32, 0.0 }
0x1221   :  { %2171 = vadd.xlane.f32.xlu1 %v2170_v33 }
0x1223   :  { %v4532_v34 = vpop.eup %4531 }
0x1224   :  { %v2173_v35 = vsel %vm177_vm2, %v4532_v34, 0.0 }
0x1225   :  { %2174 = vadd.xlane.f32.xlu0 %v2173_v35 }
0x1232   :  { %2410 = vrot.lane.b32.xlu1 %v5058_v14, %s4660_s27 }
0x123b   :  { %2332 = vrot.lane.b32.xlu0 %v5060_v16, %s4660_s27 }
0x12aa   :  { %v2172_v37 = vpop.xlane.xlu1 %2171 }
0x12ab   :  { %4533 = vrcp.f32 %v2172_v37 }
0x12ae   :  { %v2175_v38 = vpop.xlane.xlu0 %2174  ;;  %v2411_v43 = vpop.permute.xlu1 %2410 }
0x12af   :  { %4535 = vrcp.f32 %v2175_v38 }
0x12b2   :  { %v2333_v42 = vpop.permute.xlu0 %2332 }
0x12b8   :  { %v4534_v39 = vpop.eup %4533 }
0x12b9   :  { %v2177_v40 = vmul.f32 %v4534_v39, %v4530_v32 }
0x12bb   :  { %4346 = vmatmul.mubr.msk.f32.vlgmr.msra.gmra.mxu0 %vm177_vm2, %v2177_v40 }
0x12bc   :  { %v4536_v41 = vpop.eup %4535  ;;  %4354 = vmatpush3.xpose.msk.msra.mxu0 %vm177_vm2, %v2335_v45  ;;  %4355 = vmatprep.mubr.msk.f32.mxu0 %vm4656_vm1, %v4655_v6 }
0x12bd   :  { %v2179_v47 = vmul.f32 %v4536_v41, %v4532_v34  ;;  %4363 = vmatprep.subr.mxu0 %v4655_v6 }
0x12bf   :  { %4351 = vmatmul.mubr.msk.f32.vlgmr.msra.gmra.mxu1 %vm177_vm2, %v2179_v47  ;;  %4356 = vmatmul.mubr.msk.f32.vlgmr.msra.gmra.mxu0 %vm177_vm2, %v2333_v42 }
0x12c0   :  { %4359 = vmatpush3.xpose.msk.msra.mxu1 %vm177_vm2, %v2413_v36  ;;  %4360 = vmatprep.mubr.msk.f32.mxu1 %vm4656_vm1, %v4655_v6 }
0x12c1   :  { %4368 = vmatprep.subr.mxu1 %v4655_v6  ;;  %4365 = vmatprep.mubr.msk.f32.mxu0 %vm4656_vm1, %v4655_v6 }
0x12c3   :  { %4361 = vmatmul.mubr.msk.f32.vlgmr.msra.gmra.mxu1 %vm177_vm2, %v2411_v43 }
0x12c4   :  { %4370 = vmatprep.mubr.msk.f32.mxu1 %vm4656_vm1, %v4655_v6 }
0x137b   :  { %v5112_v44 = vpop.f32.mrf.mxu0 }
0x137d   :  { %v4347_v46 = vpop.f32.mrf.mxu0 }
0x137f   :  { %v5114_v48 = vpop.f32.mrf.mxu1  ;;  %v2406_v49 = vpop.f32.mrf.mxu0 }
0x1380   :  { %v2488_v50 = vsel %vm177_vm2, %v2406_v49, -inf }
0x1381   :  { %2489 = vmax.xlane.f32.xlu0 %v2488_v50  ;;  %v4352_v51 = vpop.f32.mrf.mxu1  ;;  %v4357_v52 = vpop.f32.mrf.mxu0 }
0x1383   :  { %v2484_v53 = vpop.f32.mrf.mxu1 }
0x1384   :  { %v2491_v5 = vsel %vm177_vm2, %v2484_v53, -inf }
0x1385   :  { %2492 = vmax.xlane.f32.xlu1 %v2491_v5  ;;  %v4362_v2 = vpop.f32.mrf.mxu1 }
0x1396   :  { %2510 = vrot.lane.b32.xlu1 %v5060_v16, %s4661_s28 }
0x1397   :  { %2586 = vrot.lane.b32.xlu0 %v5058_v14, %s4661_s28 }
0x139a   :  { %2664 = vrot.lane.b32.xlu1 %v5060_v16, %s4663_s0 }
0x139e   :  { %2742 = vrot.lane.b32.xlu1 %v5058_v14, %s4663_s0 }
0x13a2   :  { %2740 = vrot.lane.b32.xlu1 %v5058_v14, %s4662_s29 }
0x140a   :  { %v2490_v54 = vpop.xlane.xlu0 %2489 }
0x140b   :  { %v2494_v55 = vsub.f32 %v2406_v49, %v2490_v54 }
0x140d   :  { %v2496_v56 = vmul.f32 1.442695, %v2494_v55 }
0x140e   :  { %v2587_v57 = vpop.permute.xlu0 %2586  ;;  %v2493_v58 = vpop.xlane.xlu1 %2492 }
0x140f   :  { %4537 = vpow2.f32 %v2496_v56  ;;  %v2495_v59 = vsub.f32 %v2484_v53, %v2493_v58  ;;  %4369 = vmatpush3.msra.mxu1 %v2587_v57 }
0x1410   :  { %4378 = vmatprep.subr.mxu1 %v4655_v6 }
0x1411   :  { %v2498_v60 = vmul.f32 1.442695, %v2495_v59 }
0x1412   :  { %v2511_v61 = vpop.permute.xlu1 %2510 }
0x1413   :  { %4539 = vpow2.f32 %v2498_v60  ;;  %4364 = vmatpush3.msra.mxu0 %v2511_v61 }
0x1414   :  { %4373 = vmatprep.subr.mxu0 %v4655_v6 }
0x1416   :  { %v2665_v4 = vpop.permute.xlu1 %2664 }
0x141a   :  { %v2743_v15 = vpop.permute.xlu1 %2742 }
0x141c   :  { %v4538_v62 = vpop.eup %4537 }
0x141d   :  { %v2500_v63 = vsel %vm177_vm2, %v4538_v62, 0.0 }
0x141e   :  { %2501 = vadd.xlane.f32.xlu0 %v2500_v63  ;;  %v2741_v18 = vpop.permute.xlu1 %2740 }
0x1420   :  { %v4540_v0 = vpop.eup %4539 }
0x1421   :  { %v2503_v1 = vsel %vm177_vm2, %v4540_v0, 0.0 }
0x1422   :  { %2504 = vadd.xlane.f32.xlu0 %v2503_v1 }
0x1438   :  { %2662 = vrot.lane.b32.xlu0 %v5060_v16, %s4662_s29 }
0x14a7   :  { %v2502_v3 = vpop.xlane.xlu0 %2501 }
0x14a8   :  { %4541 = vrcp.f32 %v2502_v3 }
0x14ab   :  { %v2505_v10 = vpop.xlane.xlu0 %2504 }
0x14ac   :  { %4543 = vrcp.f32 %v2505_v10 }
0x14af   :  { %v2663_v17 = vpop.permute.xlu0 %2662 }
0x14b5   :  { %v4542_v7 = vpop.eup %4541 }
0x14b6   :  { %v2507_v12 = vmul.f32 %v4542_v7, %v4538_v62 }
0x14b8   :  { %4366 = vmatmul.mubr.msk.f32.vlgmr.msra.gmra.mxu0 %vm177_vm2, %v2507_v12 }
0x14b9   :  { %v4544_v13 = vpop.eup %4543  ;;  %4374 = vmatpush3.xpose.msk.msra.mxu0 %vm177_vm2, %v2665_v4  ;;  %4375 = vmatprep.mubr.msk.f32.mxu0 %vm4656_vm1, %v4655_v6 }
0x14ba   :  { %v2509_v11 = vmul.f32 %v4544_v13, %v4540_v0  ;;  %4383 = vmatprep.subr.mxu0 %v4655_v6 }
0x14bc   :  { %4371 = vmatmul.mubr.msk.f32.vlgmr.msra.gmra.mxu1 %vm177_vm2, %v2509_v11  ;;  %4376 = vmatmul.mubr.msk.f32.vlgmr.msra.gmra.mxu0 %vm177_vm2, %v2663_v17 }
0x14bd   :  { %4379 = vmatpush3.xpose.msk.msra.mxu1 %vm177_vm2, %v2743_v15  ;;  %4380 = vmatprep.mubr.msk.f32.mxu1 %vm4656_vm1, %v4655_v6 }
0x14be   :  { %4388 = vmatprep.subr.mxu1 %v4655_v6  ;;  %4385 = vmatprep.mubr.msk.f32.mxu0 %vm4656_vm1, %v4655_v6 }
0x14c0   :  { %4381 = vmatmul.mubr.msk.f32.vlgmr.msra.gmra.mxu1 %vm177_vm2, %v2741_v18 }
0x14c1   :  { %4390 = vmatprep.mubr.msk.f32.mxu1 %vm4656_vm1, %v4655_v6 }
0x1578   :  { %v5150_v19 = vpop.f32.mrf.mxu0 }
0x157a   :  { %v4367_v20 = vpop.f32.mrf.mxu0 }
0x157c   :  { %v5152_v21 = vpop.f32.mrf.mxu1  ;;  %v2736_v22 = vpop.f32.mrf.mxu0 }
0x157d   :  { %v2818_v23 = vsel %vm177_vm2, %v2736_v22, -inf }
0x157e   :  { %2819 = vmax.xlane.f32.xlu0 %v2818_v23  ;;  %v4372_v24 = vpop.f32.mrf.mxu1  ;;  %v4377_v25 = vpop.f32.mrf.mxu0  ;;  %v4027_v23 = vld [vmem:[%s5337_s3 + $0x20] sm:$0xff] }
0x1580   :  { %v2814_v26 = vpop.f32.mrf.mxu1 }
0x1581   :  { %v2821_v27 = vsel %vm177_vm2, %v2814_v26, -inf }
0x1582   :  { %2822 = vmax.xlane.f32.xlu1 %v2821_v27  ;;  %v4382_v28 = vpop.f32.mrf.mxu1 }
0x1593   :  { %2840 = vrot.lane.b32.xlu1 %v5060_v16, %s4664_s30 }
0x1594   :  { %2916 = vrot.lane.b32.xlu0 %v5058_v14, %s4664_s30 }
0x1597   :  { %2994 = vrot.lane.b32.xlu1 %v5060_v16, %s4665_s16 }
0x159b   :  { %3072 = vrot.lane.b32.xlu1 %v5058_v14, %s4665_s16 }
0x159f   :  { %3070 = vrot.lane.b32.xlu1 %v5058_v14, %s5360_s2 }
0x1607   :  { %v2820_v29 = vpop.xlane.xlu0 %2819 }
0x1608   :  { %v2824_v30 = vsub.f32 %v2736_v22, %v2820_v29  ;;  %v4028_v22 = vld [vmem:[%s5337_s3 + $0x28] sm:$0xff] }
0x160a   :  { %v2826_v31 = vmul.f32 1.442695, %v2824_v30 }
0x160b   :  { %v2917_v32 = vpop.permute.xlu0 %2916  ;;  %v2823_v33 = vpop.xlane.xlu1 %2822 }
0x160c   :  { %4545 = vpow2.f32 %v2826_v31  ;;  %v2825_v34 = vsub.f32 %v2814_v26, %v2823_v33  ;;  %4389 = vmatpush3.msra.mxu1 %v2917_v32 }
0x160d   :  { %4398 = vmatprep.subr.mxu1 %v4655_v6 }
0x160e   :  { %v2828_v35 = vmul.f32 1.442695, %v2825_v34 }
0x160f   :  { %v2841_v45 = vpop.permute.xlu1 %2840 }
0x1610   :  { %4547 = vpow2.f32 %v2828_v35  ;;  %4384 = vmatpush3.msra.mxu0 %v2841_v45 }
0x1611   :  { %4393 = vmatprep.subr.mxu0 %v4655_v6 }
0x1613   :  { %v2995_v47 = vpop.permute.xlu1 %2994 }
0x1617   :  { %v3073_v49 = vpop.permute.xlu1 %3072 }
0x1619   :  { %v4546_v36 = vpop.eup %4545 }
0x161a   :  { %v2830_v37 = vsel %vm177_vm2, %v4546_v36, 0.0 }
0x161b   :  { %2831 = vadd.xlane.f32.xlu0 %v2830_v37  ;;  %v3071_v52 = vpop.permute.xlu1 %3070 }
0x161d   :  { %v4548_v38 = vpop.eup %4547 }
0x161e   :  { %v2833_v39 = vsel %vm177_vm2, %v4548_v38, 0.0 }
0x161f   :  { %2834 = vadd.xlane.f32.xlu0 %v2833_v39 }
0x1635   :  { %2992 = vrot.lane.b32.xlu0 %v5060_v16, %s5360_s2 }
0x16a4   :  { %v2832_v40 = vpop.xlane.xlu0 %2831 }
0x16a5   :  { %4549 = vrcp.f32 %v2832_v40 }
0x16a8   :  { %v2835_v41 = vpop.xlane.xlu0 %2834 }
0x16a9   :  { %4551 = vrcp.f32 %v2835_v41 }
0x16ac   :  { %v2993_v51 = vpop.permute.xlu0 %2992 }
0x16b2   :  { %v4550_v42 = vpop.eup %4549 }
0x16b3   :  { %v2837_v43 = vmul.f32 %v4550_v42, %v4546_v36 }
0x16b5   :  { %4386 = vmatmul.mubr.msk.f32.vlgmr.msra.gmra.mxu0 %vm177_vm2, %v2837_v43 }
0x16b6   :  { %v4552_v46 = vpop.eup %4551  ;;  %4394 = vmatpush3.xpose.msk.msra.mxu0 %vm177_vm2, %v2995_v47  ;;  %4395 = vmatprep.mubr.msk.f32.mxu0 %vm4656_vm1, %v4655_v6 }
0x16b7   :  { %v2839_v50 = vmul.f32 %v4552_v46, %v4548_v38  ;;  %4403 = vmatprep.subr.mxu0 %v4655_v6 }
0x16b9   :  { %4391 = vmatmul.mubr.msk.f32.vlgmr.msra.gmra.mxu1 %vm177_vm2, %v2839_v50  ;;  %4396 = vmatmul.mubr.msk.f32.vlgmr.msra.gmra.mxu0 %vm177_vm2, %v2993_v51 }
0x16ba   :  { %4399 = vmatpush3.xpose.msk.msra.mxu1 %vm177_vm2, %v3073_v49  ;;  %4400 = vmatprep.mubr.msk.f32.mxu1 %vm4656_vm1, %v4655_v6 }
0x16bb   :  { %4408 = vmatprep.subr.mxu1 %v4655_v6  ;;  %4405 = vmatprep.mubr.msk.f32.mxu0 %vm4656_vm1, %v4655_v6 }
0x16bd   :  { %4401 = vmatmul.mubr.msk.f32.vlgmr.msra.gmra.mxu1 %vm177_vm2, %v3071_v52 }
0x16be   :  { %4410 = vmatprep.mubr.msk.f32.mxu1 %vm4656_vm1, %v4655_v6 }
0x1775   :  { %v2912_v53 = vpop.f32.mrf.mxu0 }
0x1777   :  { %v4387_v5 = vpop.f32.mrf.mxu0 }
0x1779   :  { %v2988_v2 = vpop.f32.mrf.mxu1  ;;  %v3066_v54 = vpop.f32.mrf.mxu0 }
0x177a   :  { %v3148_v55 = vsel %vm177_vm2, %v3066_v54, -inf }
0x177b   :  { %3149 = vmax.xlane.f32.xlu0 %v3148_v55  ;;  %v4392_v56 = vpop.f32.mrf.mxu1  ;;  %v4397_v57 = vpop.f32.mrf.mxu0 }
0x177c   :  { %v4041_v56 = vld [vmem:[%s5341_s7 + $0x30] sm:$0xff]  ;;  %v4040_v57 = vld [vmem:[%s5341_s7 + $0x28] sm:$0xff] }
0x177d   :  { %v3144_v58 = vpop.f32.mrf.mxu1 }
0x177e   :  { %v3151_v59 = vsel %vm177_vm2, %v3144_v58, -inf }
0x177f   :  { %3152 = vmax.xlane.f32.xlu1 %v3151_v59  ;;  %v4402_v60 = vpop.f32.mrf.mxu1 }
0x1790   :  { %3170 = vrot.lane.b32.xlu1 %v5060_v16, %s5361_s24 }
0x1794   :  { %3324 = vrot.lane.b32.xlu1 %v5150_v19, %s5362_s25 }
0x1798   :  { %3326 = vrot.lane.b32.xlu1 %v5152_v21, %s5362_s25  ;;  %v4029_v21 = vld [vmem:[%s5337_s3 + $0x30] sm:$0xff] }
0x179c   :  { %3334 = vrot.lane.b32.xlu1 %v2988_v2, %s5363_s26 }
0x1804   :  { %v3150_v61 = vpop.xlane.xlu0 %3149 }
0x1805   :  { %v3154_v62 = vsub.f32 %v3066_v54, %v3150_v61 }
0x1807   :  { %v3156_v63 = vmul.f32 1.442695, %v3154_v62 }
0x1808   :  { %v3153_v0 = vpop.xlane.xlu1 %3152 }
0x1809   :  { %4553 = vpow2.f32 %v3156_v63  ;;  %v3155_v1 = vsub.f32 %v3144_v58, %v3153_v0  ;;  %v4039_v58 = vld [vmem:[%s5341_s7 + $0x20] sm:$0xff] }
0x180b   :  { %v3158_v3 = vmul.f32 1.442695, %v3155_v1 }
0x180c   :  { %v3171_v10 = vpop.permute.xlu1 %3170 }
0x180d   :  { %4555 = vpow2.f32 %v3158_v3  ;;  %4404 = vmatpush3.msra.mxu0 %v3171_v10  ;;  %v4037_v3 = vld [vmem:[%s5339_s5 + $0x1] ss:$0 sm:$0xff] }
0x1810   :  { %v3325_v28 = vpop.permute.xlu1 %3324 }
0x1811   :  { %v3346_v31 = vsel %vm177_vm2, %v5112_v44, %v3325_v28  ;;  %v4032_v44 = vld [vmem:[%s5338_s4 + $0x1] ss:$0 sm:$0xff] }
0x1814   :  { %v3327_v29 = vpop.permute.xlu1 %3326 }
0x1815   :  { %v3347_v45 = vsel %vm177_vm2, %v5114_v48, %v3327_v29 }
0x1816   :  { %v4554_v4 = vpop.eup %4553 }
0x1817   :  { %v3160_v16 = vsel %vm177_vm2, %v4554_v4, 0.0 }
0x1818   :  { %3161 = vadd.xlane.f32.xlu0 %v3160_v16  ;;  %v3335_v32 = vpop.permute.xlu1 %3334 }
0x1819   :  { %v3349_v36 = vsel %vm1519_vm4, %v3347_v45, %v3335_v32 }
0x181a   :  { %v4556_v7 = vpop.eup %4555 }
0x181b   :  { %v3163_v12 = vsel %vm177_vm2, %v4556_v7, 0.0 }
0x181c   :  { %3164 = vadd.xlane.f32.xlu0 %v3163_v12 }
0x1832   :  { %3246 = vrot.lane.b32.xlu0 %v5058_v14, %s5361_s24  ;;  %v4030_v14 = vld [vmem:[%s5337_s3 + $0x38] sm:$0xff] }
0x1833   :  { %4413 = vmatprep.subr.mxu0 %v4030_v14 }
0x1836   :  { %3332 = vrot.lane.b32.xlu0 %v2912_v53, %s5363_s26  ;;  %s4670_s26 = smov [#allocation7]  }
0x1837   :  { %s3945_s27 = sshll.u32 %s4670_s26, 4  ;;  %s3946_s27 = int_to_ptr.vmem [resolvable:$true] %s3945_s27 }
0x1838   :  { %p4630_p11 = scmp.lt.s32.totalorder %s3946_s27, %s3946_s27 }
0x18a1   :  { %v3162_v13 = vpop.xlane.xlu0 %3161 }
0x18a2   :  { %4557 = vrcp.f32 %v3162_v13 }
0x18a5   :  { %v3165_v15 = vpop.xlane.xlu0 %3164 }
0x18a6   :  { %4559 = vrcp.f32 %v3165_v15 }
0x18a9   :  { %v3247_v11 = vpop.permute.xlu0 %3246 }
0x18aa   :  { %4409 = vmatpush3.msra.mxu1 %v3247_v11 }
0x18ad   :  { %v3333_v30 = vpop.permute.xlu0 %3332 }
0x18ae   :  { %v3348_v33 = vsel %vm1519_vm4, %v3346_v31, %v3333_v30 }
0x18af   :  { %v4558_v17 = vpop.eup %4557 }
0x18b0   :  { %v3167_v18 = vmul.f32 %v4558_v17, %v4554_v4  ;;  %v4038_v4 = vld [vmem:[%s5340_s6 + $0x1] ss:$0 sm:$0xff]  ;;  %v4054_v17 = vld [vmem:[%s5343_s9 + $0x78] sm:$0xff] }
0x18b2   :  { %4406 = vmatmul.mubr.msk.f32.vlgmr.msra.gmra.mxu0 %vm177_vm2, %v3167_v18  ;;  %v4053_v18 = vld [vmem:[%s5343_s9 + $0x70] sm:$0xff] }
0x18b3   :  { %v4560_v19 = vpop.eup %4559  ;;  %4414 = vmatpush3.msra.mxu0 %v4030_v14  ;;  %v4050_v14 = vld [vmem:[%s5343_s9 + $0x58] sm:$0xff] }
0x18b4   :  { %v3169_v20 = vmul.f32 %v4560_v19, %v4556_v7  ;;  %4415 = vmatprep.subr.mxu0 %v4029_v21  ;;  %v4052_v19 = vld [vmem:[%s5343_s9 + $0x68] sm:$0xff] }
0x18b5   :  { %4416 = vmatpush3.msra.mxu0 %v4029_v21  ;;  %v4049_v21 = vld [vmem:[%s5343_s9 + $0x50] sm:$0xff] }
0x18b6   :  { %4411 = vmatmul.mubr.msk.f32.vlgmr.msra.gmra.mxu1 %vm177_vm2, %v3169_v20  ;;  %4417 = vmatprep.subr.mxu0 %v4028_v22  ;;  %v4051_v20 = vld [vmem:[%s5343_s9 + $0x60] sm:$0xff] }
0x18b7   :  { %4418 = vmatpush3.msra.mxu0 %v4028_v22  ;;  %v4048_v22 = vld [vmem:[%s5343_s9 + $0x48] sm:$0xff] }
0x18b8   :  { %4419 = vmatprep.subr.mxu0 %v4027_v23 }
0x18b9   :  { %4420 = vmatpush3.msra.mxu0 %v4027_v23  ;;  %v4047_v23 = vld [vmem:[%s5343_s9 + $0x40] sm:$0xff] }
0x18ba   :  { %4435 = vmatprep.subr.mxu0 %v4054_v17 }
0x1972   :  { %v3242_v24 = vpop.f32.mrf.mxu0 }
0x1973   :  { %3340 = vrot.lane.b32.xlu0 %v3242_v24, %s5364_s17  ;;  %v4044_v24 = vld [vmem:[%s5342_s8 + $0x1] ss:$0 sm:$0xff] }
0x1974   :  { %v4407_v25 = vpop.f32.mrf.mxu0 }
0x1976   :  { %v3318_v26 = vpop.f32.mrf.mxu1 }
0x1977   :  { %3342 = vrot.lane.b32.xlu1 %v3318_v26, %s5364_s17 }
0x1978   :  { %v4412_v27 = vpop.f32.mrf.mxu1 }
0x19e5   :  { %v3341_v34 = vpop.permute.xlu0 %3340 }
0x19e6   :  { %v3350_v35 = vsel %vm1522_vm3, %v3348_v33, %v3341_v34 }
0x19e7   :  { %4421 = vmatprep.mubr.msk.f32.mxu0 %vm92_vm0, %v3350_v35 }
0x19e9   :  { %v3343_v37 = vpop.permute.xlu1 %3342 }
0x19ea   :  { %v3351_v38 = vsel %vm1522_vm3, %v3349_v36, %v3343_v37 }
0x19eb   :  { %4422 = vmatmul.mubr.msk.f32.vlgmr.msra.gmra.mxu0 %vm92_vm0, %v3351_v38  ;;  %v4056_v38 = vld [vmem:[%s5344_s10 + $0x1] ss:$0 sm:$0xff] }
0x19ec   :  { %4436 = vmatpush3.msra.mxu0 %v4054_v17  ;;  %v3853_v17 = vld [vmem:[#allocation5 + $0x10] sm:$0xff] }
0x19ed   :  { %4437 = vmatprep.subr.mxu0 %v4053_v18 }
0x19ee   :  { %4438 = vmatpush3.msra.mxu0 %v4053_v18  ;;  %v3852_v18 = vld [vmem:[#allocation5 + $0x8] sm:$0xff] }
0x19ef   :  { %4439 = vmatprep.subr.mxu0 %v4052_v19 }
0x19f0   :  { %4440 = vmatpush3.msra.mxu0 %v4052_v19  ;;  %v3851_v19 = vld [vmem:[#allocation5] sm:$0xff] }
0x19f1   :  { %4441 = vmatprep.subr.mxu0 %v4051_v20 }
0x19f2   :  { %4442 = vmatpush3.msra.mxu0 %v4051_v20 }
0x19f3   :  { %4443 = vmatprep.subr.mxu0 %v4050_v14 }
0x19f4   :  { %4444 = vmatpush3.msra.mxu0 %v4050_v14 }
0x19f5   :  { %4445 = vmatprep.subr.mxu0 %v4049_v21 }
0x19f6   :  { %4446 = vmatpush3.msra.mxu0 %v4049_v21 }
0x19f7   :  { %4447 = vmatprep.subr.mxu0 %v4048_v22 }
0x19f8   :  { %4448 = vmatpush3.msra.mxu0 %v4048_v22 }
0x19f9   :  { %4449 = vmatprep.subr.mxu0 %v4047_v23 }
0x19fa   :  { %4450 = vmatpush3.msra.mxu0 %v4047_v23 }
0x1aab   :  { %v4423_v39 = vpop.f32.mrf.mxu0 }
0x1aac   :  { %v3443_v40 = vadd.f32 %v4423_v39, %v4032_v44 }
0x1aad   :  { %v3437_v41 = vpop.f32.mrf.mxu0 }
0x1aae   :  { %v3447_v47 = vadd.f32 %v3443_v40, %v5047_v9  ;;  %v3438_v42 = vadd.f32 %v4032_v44, %v3437_v41 }
0x1ab0   :  { %v3455_v43 = vsel %vm92_vm0, %v3447_v47, 0.0  ;;  %v3446_v48 = vadd.f32 %v3438_v42, %v5045_v8  ;;  %v4042_v8 = vld [vmem:[%s5341_s7 + $0x38] sm:$0xff]  ;;  %s4625_s7 = scalar_lea.vmem %s3946_s27, 32 }
0x1ab1   :  { %3456 = vadd.xlane.f32.xlu1 %v3455_v43  ;;  %4424 = vmatprep.subr.mxu1 %v4042_v8  ;;  %p4626_p10 = scmp.ne.s32.totalorder %s3946_s27, %s4625_s7  ;;  %p4631_p12 = scmp.lt.s32.totalorder %s4625_s7, %s4625_s7 }
0x1ab2   :  { %v3452_v46 = vsel %vm92_vm0, %v3446_v48, 0.0  ;;  %4425 = vmatpush3.msra.mxu1 %v4042_v8 }
0x1ab3   :  { %3453 = vadd.xlane.f32.xlu0 %v3452_v46  ;;  %4426 = vmatprep.subr.mxu1 %v4041_v56  ;;  %p4632_p13 = por %p4631_p12, %p4630_p11 }
0x1ab4   :  { %4427 = vmatpush3.msra.mxu1 %v4041_v56 }
0x1ab5   :  { %4428 = vmatprep.subr.mxu1 %v4040_v57  ;;  %p4633_p0 = pnand %p4632_p13, %p4626_p10 }
0x1ab6   :  { %4429 = vmatpush3.msra.mxu1 %v4040_v57 }
0x1ab7   :  { %4430 = vmatprep.subr.mxu1 %v4039_v58 }
0x1ab8   :  { %4431 = vmatpush3.msra.mxu1 %v4039_v58 }
0x1ab9   :  { %4454 = vmatprep.subr.mxu1 %v4655_v6 }
0x1b3a   :  { %v3457_v49 = vpop.xlane.xlu1 %3456 }
0x1b3b   :  { %v3459_v50 = vmul.f32 0.03125, %v3457_v49 }
0x1b3c   :  { %v3454_v51 = vpop.xlane.xlu0 %3453 }
0x1b3d   :  { %v3458_v52 = vmul.f32 0.03125, %v3454_v51  ;;  %v3461_v53 = vsub.f32 %v3447_v47, %v3459_v50 }
0x1b3f   :  { %v3460_v5 = vsub.f32 %v3446_v48, %v3458_v52  ;;  %v3463_v55 = vmul.f32 %v3461_v53, %v3461_v53 }
0x1b41   :  { %v3462_v2 = vmul.f32 %v3460_v5, %v3460_v5  ;;  %v3467_v9 = vsel %vm92_vm0, %v3463_v55, 0.0 }
0x1b43   :  { %v3464_v54 = vsel %vm92_vm0, %v3462_v2, 0.0 }
0x1b44   :  { %3465 = vadd.xlane.f32.xlu0 %v3464_v54 }
0x1b48   :  { %3468 = vadd.xlane.f32.xlu0 %v3467_v9 }
0x1bcd   :  { %v3466_v59 = vpop.xlane.xlu0 %3465 }
0x1bce   :  { %v3470_v60 = vmul.f32 0.03125, %v3466_v59 }
0x1bd0   :  { %v3472_v61 = vadd.f32 1e-05, %v3470_v60 }
0x1bd1   :  { %v3469_v62 = vpop.xlane.xlu0 %3468 }
0x1bd2   :  { %4561 = vrsqrt.f32 %v3472_v61  ;;  %v3471_v63 = vmul.f32 0.03125, %v3469_v62  ;;  %v4061_v61 = vld [vmem:[%s5345_s11 + $0x1] ss:$0 sm:$0xff] }
0x1bd4   :  { %v3473_v0 = vadd.f32 1e-05, %v3471_v63 }
0x1bd6   :  { %4563 = vrsqrt.f32 %v3473_v0  ;;  %v4062_v0 = vld [vmem:[%s5346_s12 + $0x1] ss:$0 sm:$0xff] }
0x1bdf   :  { %v4562_v1 = vpop.eup %4561 }
0x1be0   :  { %v3476_v10 = vmul.f32 %v4562_v1, %v3460_v5 }
0x1be2   :  { %v3484_v16 = vmul.f32 %v4037_v3, %v3476_v10 }
0x1be3   :  { %v4564_v7 = vpop.eup %4563 }
0x1be4   :  { %v3477_v12 = vmul.f32 %v4564_v7, %v3461_v53  ;;  %v3492_v13 = vadd.f32 %v4038_v4, %v3484_v16 }
0x1be6   :  { %v3485_v15 = vmul.f32 %v4037_v3, %v3477_v12  ;;  %4432 = vmatprep.mubr.msk.f32.mxu1 %vm92_vm0, %v3492_v13 }
0x1be8   :  { %v3493_v11 = vadd.f32 %v4038_v4, %v3485_v15 }
0x1bea   :  { %4433 = vmatmul.mubr.msk.f32.vlgmr.msra.gmra.mxu1 %vm92_vm0, %v3493_v11 }
0x1beb   :  { %4462 = vmatprep.mubr.msk.f32.mxu1 %vm4656_vm1, %v4655_v6 }
0x1caa   :  { %v4434_v25 = vpop.f32.mrf.mxu1 }
0x1cab   :  { %v3585_v26 = vadd.f32 %v4434_v25, %v4044_v24 }
0x1cac   :  { %v3579_v27 = vpop.f32.mrf.mxu1 }
0x1cad   :  { %v3591_v28 = vmul.f32 0.70710677, %v3585_v26  ;;  %v3580_v29 = vadd.f32 %v4044_v24, %v3579_v27  ;;  %v3589_v45 = vmul.f32 0.5, %v3585_v26 }
0x1caf   :  { %4565 = verf.f32 %v3591_v28  ;;  %v3590_v30 = vmul.f32 0.70710677, %v3580_v29  ;;  %v3588_v34 = vmul.f32 0.5, %v3580_v29 }
0x1cb1   :  { %4567 = verf.f32 %v3590_v30 }
0x1cbc   :  { %v4566_v31 = vpop.eup %4565 }
0x1cbd   :  { %v3595_v33 = vadd.f32 1.0, %v4566_v31 }
0x1cbe   :  { %v4568_v32 = vpop.eup %4567 }
0x1cbf   :  { %v3594_v35 = vadd.f32 1.0, %v4568_v32  ;;  %v3597_v37 = vmul.f32 %v3595_v33, %v3589_v45 }
0x1cc1   :  { %v3596_v36 = vmul.f32 %v3594_v35, %v3588_v34 }
0x1cc3   :  { %4451 = vmatprep.mubr.msk.f32.mxu0 %vm1782_vm5, %v3596_v36 }
0x1cc4   :  { %4452 = vmatmul.mubr.msk.f32.vlgmr.msra.gmra.mxu0 %vm1782_vm5, %v3597_v37 }
0x1d84   :  { %v4453_v44 = vpop.f32.mrf.mxu0 }
0x1d85   :  { %v3693_v39 = vadd.f32 %v4453_v44, %v4056_v38 }
0x1d86   :  { %v3687_v40 = vpop.f32.mrf.mxu0 }
0x1d87   :  { %v3688_v41 = vadd.f32 %v4056_v38, %v3687_v40  ;;  %v3697_v47 = vadd.f32 %v3693_v39, %v3493_v11  ;;  %v3854_v11 = vld [vmem:[#allocation5 + $0x18] sm:$0xff] }
0x1d88   :  { %4455 = vmatpush3.msra.mxu1 %v3854_v11 }
0x1d89   :  { %v3696_v42 = vadd.f32 %v3688_v41, %v3492_v13  ;;  %v3705_v43 = vsel %vm92_vm0, %v3697_v47, 0.0  ;;  %4456 = vmatprep.subr.mxu1 %v4655_v6 }
0x1d8a   :  { %3706 = vadd.xlane.f32.xlu0 %v3705_v43  ;;  %4457 = vmatpush3.msra.mxu1 %v3853_v17 }
0x1d8b   :  { %v3702_v48 = vsel %vm92_vm0, %v3696_v42, 0.0  ;;  %4458 = vmatprep.subr.mxu1 %v4655_v6 }
0x1d8c   :  { %3703 = vadd.xlane.f32.xlu1 %v3702_v48  ;;  %4459 = vmatpush3.msra.mxu1 %v3852_v18 }
0x1d8d   :  { %4460 = vmatprep.subr.mxu1 %v4655_v6 }
0x1d8e   :  { %4461 = vmatpush3.msra.mxu1 %v3851_v19 }
0x1e13   :  { %v3707_v46 = vpop.xlane.xlu0 %3706 }
0x1e14   :  { %v3709_v49 = vmul.f32 0.03125, %v3707_v46 }
0x1e15   :  { %v3704_v50 = vpop.xlane.xlu1 %3703 }
0x1e16   :  { %v3711_v51 = vsub.f32 %v3697_v47, %v3709_v49  ;;  %v3708_v52 = vmul.f32 0.03125, %v3704_v50 }
0x1e18   :  { %v3710_v53 = vsub.f32 %v3696_v42, %v3708_v52  ;;  %v3713_v5 = vmul.f32 %v3711_v51, %v3711_v51 }
0x1e1a   :  { %v3717_v2 = vsel %vm92_vm0, %v3713_v5, 0.0  ;;  %v3712_v54 = vmul.f32 %v3710_v53, %v3710_v53 }
0x1e1b   :  { %3718 = vadd.xlane.f32.xlu0 %v3717_v2 }
0x1e1c   :  { %v3714_v55 = vsel %vm92_vm0, %v3712_v54, 0.0 }
0x1e1d   :  { %3715 = vadd.xlane.f32.xlu1 %v3714_v55 }
0x1ea4   :  { %v3719_v9 = vpop.xlane.xlu0 %3718 }
0x1ea5   :  { %v3721_v8 = vmul.f32 0.03125, %v3719_v9 }
0x1ea6   :  { %v3716_v56 = vpop.xlane.xlu1 %3715 }
0x1ea7   :  { %v3723_v57 = vadd.f32 1e-05, %v3721_v8  ;;  %v3720_v58 = vmul.f32 0.03125, %v3716_v56 }
0x1ea9   :  { %4569 = vrsqrt.f32 %v3723_v57  ;;  %v3722_v59 = vadd.f32 1e-05, %v3720_v58 }
0x1eab   :  { %4571 = vrsqrt.f32 %v3722_v59 }
0x1eb6   :  { %v4570_v60 = vpop.eup %4569 }
0x1eb7   :  { %v3727_v62 = vmul.f32 %v4570_v60, %v3711_v51 }
0x1eb8   :  { %v4572_v63 = vpop.eup %4571 }
0x1eb9   :  { %v3726_v1 = vmul.f32 %v4572_v63, %v3710_v53  ;;  %v3735_v3 = vmul.f32 %v4061_v61, %v3727_v62 }
0x1ebb   :  { %v5302_v10 = vadd.f32 %v4062_v0, %v3735_v3  ;;  %v3734_v4 = vmul.f32 %v4061_v61, %v3726_v1 }
0x1ebd   :  { %v3776_v16 = vmul.f32 %v5302_v10, %v5302_v10  ;;  %v5306_v7 = vadd.f32 %v4062_v0, %v3734_v4  ;;  %v3751_v56 = vsel %vm92_vm0, %v5302_v10, 0.0  ;;  %v3768_v61 = vsel %vm92_vm0, %v5302_v10, -inf }
0x1ebe   :  { %v3752_v59 = vrot.slane %v3751_v56, 4  ;;  %v3769_v1 = vrot.slane %v3768_v61, 4 }
0x1ebf   :  { %v3780_v12 = vsel %vm92_vm0, %v3776_v16, 0.0  ;;  %v3775_v13 = vmul.f32 %v5306_v7, %v5306_v7  ;;  %v3744_v8 = vsel %vm92_vm0, %v5306_v7, 0.0  ;;  %v3761_v60 = vsel %vm92_vm0, %v5306_v7, -inf }
0x1ec0   :  { %3781 = vadd.xlane.f32.xlu0 %v3780_v12  ;;  %v3745_v58 = vrot.slane %v3744_v8, 4  ;;  %v3753_v63 = vadd.f32 %v3752_v59, %v3751_v56  ;;  %v3762_v0 = vrot.slane %v3761_v60, 4 }
0x1ec1   :  { %v3777_v15 = vsel %vm92_vm0, %v3775_v13, 0.0  ;;  %v3770_v13 = vmax.f32 %v3768_v61, %v3769_v1 }
0x1ec2   :  { %3778 = vadd.xlane.f32.xlu1 %v3777_v15  ;;  %v3746_v62 = vadd.f32 %v3745_v58, %v3744_v8  ;;  %v3754_v4 = vrot.slane %v3753_v63, 2  ;;  %v3763_v12 = vmax.f32 %v3761_v60, %v3762_v0 }
0x1ec4   :  { %v3747_v3 = vrot.slane %v3746_v62, 2  ;;  %v3755_v18 = vadd.f32 %v3754_v4, %v3753_v63 }
0x1ec6   :  { %v3748_v17 = vadd.f32 %v3747_v3, %v3746_v62 }
0x1f49   :  { %v3782_v20 = vpop.xlane.xlu0 %3781 }
0x1f4a   :  { %4573 = vrsqrt.f32 %v3782_v20  ;;  %vm3792_vm6 = vcmp.eq.f32.partialorder %v3782_v20, inf  ;;  %v3795_v24 = vand.u32 2147483648, %v3782_v20  ;;  %vm3794_vm7 = vcmp.eq.f32.partialorder %v3782_v20, 0.0 }
0x1f4b   :  { %v3779_v14 = vpop.xlane.xlu1 %3778 }
0x1f4c   :  { %4575 = vrsqrt.f32 %v3779_v14  ;;  %vm3785_vm8 = vcmp.eq.f32.partialorder %v3779_v14, inf  ;;  %v3788_v28 = vand.u32 2147483648, %v3779_v14  ;;  %vm3787_vm9 = vcmp.eq.f32.partialorder %v3779_v14, 0.0 }
0x1f57   :  { %v4574_v21 = vpop.eup %4573 }
0x1f58   :  { %v3791_v22 = vmul.f32 %v4574_v21, %v3782_v20  ;;  %v3771_v21 = vrot.slane %v3770_v13, 2 }
0x1f59   :  { %v4576_v23 = vpop.eup %4575 }
0x1f5a   :  { %v3793_v25 = vsel %vm3792_vm6, %v3782_v20, %v3791_v22  ;;  %v3784_v26 = vmul.f32 %v4576_v23, %v3779_v14 }
0x1f5b   :  { %v3796_v27 = vsel %vm3794_vm7, %v3795_v24, %v3793_v25  ;;  %v3749_v24 = vrot.slane %v3748_v17, 1  ;;  %v3756_v25 = vrot.slane %v3755_v18, 1 }
0x1f5c   :  { %v3803_v29 = vrot.slane %v3796_v27, 4  ;;  %v3786_v30 = vsel %vm3785_vm8, %v3779_v14, %v3784_v26  ;;  %v3764_v14 = vrot.slane %v3763_v12, 2 }
0x1f5d   :  { %v3789_v6 = vsel %vm3787_vm9, %v3788_v28, %v3786_v30 }
0x1f5e   :  { %v3804_v31 = vmax.f32 %v3796_v27, %v3803_v29  ;;  %v3797_v32 = vrot.slane %v3789_v6, 4  ;;  %v3765_v28 = vmax.f32 %v3763_v12, %v3764_v14  ;;  %v3772_v29 = vmax.f32 %v3770_v13, %v3771_v21 }
0x1f60   :  { %v3805_v33 = vrot.slane %v3804_v31, 2  ;;  %v3798_v34 = vmax.f32 %v3789_v6, %v3797_v32  ;;  %v3757_v32 = vadd.f32 %v3756_v25, %v3755_v18 }
0x1f62   :  { %v3806_v35 = vmax.f32 %v3804_v31, %v3805_v33  ;;  %v3799_v45 = vrot.slane %v3798_v34, 2  ;;  %v3750_v31 = vadd.f32 %v3749_v24, %v3748_v17 }
0x1f64   :  { %v3807_v36 = vrot.slane %v3806_v35, 1  ;;  %v3800_v37 = vmax.f32 %v3798_v34, %v3799_v45 }
0x1f66   :  { %v3808_v38 = vmax.f32 %v3806_v35, %v3807_v36  ;;  %v3801_v44 = vrot.slane %v3800_v37, 1  ;;  %v3773_v35 = vrot.slane %v3772_v29, 1 }
0x1f68   :  { %v3810_v39 = vsub.f32 %v3796_v27, %v3808_v38  ;;  %v3802_v40 = vmax.f32 %v3800_v37, %v3801_v44  ;;  %v3760_v37 = vmul.f32 0.125, %v3757_v32 }
0x1f6a   :  { %v3813_v41 = vmul.f32 1.442695, %v3810_v39  ;;  %v3809_v47 = vsub.f32 %v3789_v6, %v3802_v40  ;;  %v3774_v40 = vmax.f32 %v3772_v29, %v3773_v35 }
0x1f6c   :  { %4577 = vpow2.f32 %v3813_v41  ;;  %v3811_v42 = vmul.f32 1.442695, %v3809_v47 }
0x1f6e   :  { %4579 = vpow2.f32 %v3811_v42 }
0x1f79   :  { %v4578_v43 = vpop.eup %4577 }
0x1f7a   :  { %v3821_v48 = vrot.slane %v4578_v43, 4 }
0x1f7b   :  { %v4580_v46 = vpop.eup %4579 }
0x1f7c   :  { %v3815_v49 = vrot.slane %v4580_v46, 4  ;;  %v3822_v50 = vadd.f32 %v4578_v43, %v3821_v48  ;;  %v3848_v48 = vadd.f32 %v3774_v40, %v3760_v37 }
0x1f7e   :  { %v3816_v51 = vadd.f32 %v4580_v46, %v3815_v49  ;;  %v3823_v52 = vrot.slane %v3822_v50, 2 }
0x1f80   :  { %v3817_v53 = vrot.slane %v3816_v51, 2  ;;  %v3824_v5 = vadd.f32 %v3823_v52, %v3822_v50 }
0x1f82   :  { %v3818_v2 = vadd.f32 %v3817_v53, %v3816_v51  ;;  %v3825_v54 = vrot.slane %v3824_v5, 1  ;;  %v4063_v51 = vld [vmem:[%s5348_s14] ss:$0 sm:$0xff] }
0x1f84   :  { %v3819_v55 = vrot.slane %v3818_v2, 1  ;;  %v3826_v9 = vadd.f32 %v3825_v54, %v3824_v5 }
0x1f86   :  { %v3820_v57 = vadd.f32 %v3819_v55, %v3818_v2  ;;  %4581 = vrcp.f32 %v3826_v9 }
0x1f88   :  { %4583 = vrcp.f32 %v3820_v57 }
0x1f93   :  { %v4582_v16 = vpop.eup %4581 }
0x1f94   :  { %v3830_v15 = vmul.f32 %v4582_v16, %v4578_v43 }
0x1f95   :  { %v4584_v11 = vpop.eup %4583 }
0x1f96   :  { %v3828_v19 = vmul.f32 %v4584_v11, %v4580_v46  ;;  %v3832_v20 = vmul.f32 %v3830_v15, %v5302_v10  ;;  %v3766_v10 = vrot.slane %v3765_v28, 1 }
0x1f98   :  { %v3831_v22 = vmul.f32 %v3828_v19, %v5306_v7  ;;  %v3840_v23 = vsel %vm92_vm0, %v3832_v20, 0.0  ;;  %v3759_v7 = vmul.f32 0.125, %v3750_v31  ;;  %v3767_v39 = vmax.f32 %v3765_v28, %v3766_v10 }
0x1f99   :  { %v3841_v26 = vrot.slane %v3840_v23, 4 }
0x1f9a   :  { %v3833_v27 = vsel %vm92_vm0, %v3831_v22, 0.0  ;;  %v3847_v43 = vadd.f32 %v3767_v39, %v3759_v7 }
0x1f9b   :  { %v3834_v30 = vrot.slane %v3833_v27, 4  ;;  %v3842_v6 = vadd.f32 %v3841_v26, %v3840_v23 }
0x1f9d   :  { %v3835_v33 = vadd.f32 %v3834_v30, %v3833_v27  ;;  %v3843_v34 = vrot.slane %v3842_v6, 2 }
0x1f9f   :  { %v3836_v45 = vrot.slane %v3835_v33, 2  ;;  %v3844_v36 = vadd.f32 %v3843_v34, %v3842_v6 }
0x1fa1   :  { %v3837_v38 = vadd.f32 %v3836_v45, %v3835_v33  ;;  %v3845_v44 = vrot.slane %v3844_v36, 1 }
0x1fa3   :  { %v3838_v41 = vrot.slane %v3837_v38, 1  ;;  %v3846_v47 = vadd.f32 %v3845_v44, %v3844_v36 }
0x1fa5   :  { %v3839_v42 = vadd.f32 %v3838_v41, %v3837_v38  ;;  %v3850_v49 = vadd.f32 %v3848_v48, %v3846_v47 }
0x1fa7   :  { %v3849_v46 = vadd.f32 %v3847_v43, %v3839_v42 }
0x1fa9   :  { %v3865_v50 = vsel %vm3864_vm10, %v3850_v49, %v3849_v46 }
0x1faa   :  { %4463 = vmatmul.mubr.msk.f32.vlgmr.msra.gmra.mxu1 %vm92_vm0, %v3865_v50 }
0x206a   :  { %v3934_v52 = vpop.f32.mrf.mxu1 }
0x206b   :  { %v3935_v53 = vadd.f32 %v4063_v51, %v3934_v52 }
0x206c   :  { %v4464_v5 = vpop.f32.mrf.mxu1 }
0x206d   :  { %3938 = vst [vmem:[#allocation7] sm:$0x3] %v3935_v53 }
0x206e   :  { %4636 = shalt.err (!%p4633_p0)
}
0x206f   :  { %3948 = dma.vmem_to_hbm [thread:$0]  %s3946_s27, 32, %s5349_s15, [#allocation4]  }
0x2070   :  { %4649 = dma.done.wait [#allocation4], 32  }
0x2071   :  { %4650 = vsyncadd [#allocation4], 4294967264 }
0x2072   :  { %3952 = vsyncpa [#allocation3], 1 }
0x2073   :  { %3953 = vsyncpa [#allocation6], 1 }
0x2074   :  { %3954 = vsyncpa [#allocation4], 1 }

</bundles_post_ra>
